<compile_context>
chip_gen: v7x
topology: tpu7x:2x2x1
jax: 0.10.0
libtpu: 0.0.40
codegen_flags: <defaults>
</compile_context>

<pallas_src>
import functools

import jax
import jax.numpy as jnp
from jax.experimental import pallas as pl
from jax.experimental.pallas import tpu as pltpu

EPS = 1e-5
LANE = 128


def _round_up(x, m):
    return (x + m - 1) // m * m


# ---------------------------------------------------------------------------
# in-kernel helpers
# ---------------------------------------------------------------------------
def _conv3x3_im2col(feat, pad_ref, w_ref):
    """3x3 'same' conv of feat (Hp, Wp, C) as ONE im2col matmul on the MXU.

    pad_ref: (Hp+2, Wp+2, C) f32 VMEM scratch. Only the 1-pixel halo is
    zeroed; the interior is fully overwritten every grid step.
    w_ref:   (9*C, Cout_p) f32 weights, tap-major ((dy*3+dx)*C + ci).
    Returns the raw conv output, shape (Hp*Wp, Cout_p), f32.
    """
    Hp, Wp, C = feat.shape
    M = Hp * Wp

    # zero only the halo, then write the interior
    zrow = jnp.zeros((1, Wp + 2, C), jnp.float32)
    zcol = jnp.zeros((Hp, 1, C), jnp.float32)
    pad_ref[0:1, :, :] = zrow
    pad_ref[Hp + 1:Hp + 2, :, :] = zrow
    pad_ref[1:Hp + 1, 0:1, :] = zcol
    pad_ref[1:Hp + 1, Wp + 1:Wp + 2, :] = zcol
    pad_ref[1:Hp + 1, 1:Wp + 1, :] = feat

    # im2col patch: the 9 shifted views concatenated along the channel axis
    taps = [pad_ref[dy:dy + Hp, dx:dx + Wp, :].reshape(M, C)
            for dy in range(3) for dx in range(3)]
    patch = jnp.concatenate(taps, axis=-1)                  # (M, 9*C)

    # single MXU dot with K = 9*C (instead of 9 tiny K=C dots)
    return jnp.dot(patch, w_ref[...],
                   preferred_element_type=jnp.float32)      # (M, Cout_p)


def _store_conv_and_stats(acc, y_ref, stat_ref):
    """Write raw conv output + per-block BN partial sums (sum, sum-of-squares)."""
    _, Hp, Wp, Cp = y_ref.shape
    y_ref[0] = acc.reshape(Hp, Wp, Cp)
    stat_ref[0, 0:1, :] = jnp.sum(acc, axis=0, keepdims=True)
    stat_ref[0, 1:2, :] = jnp.sum(acc * acc, axis=0, keepdims=True)


# ---------------------------------------------------------------------------
# kernels (grid = (N,), one batch element per grid step, "parallel")
# ---------------------------------------------------------------------------
def _pool_conv_kernel(x_ref, w_ref, y_ref, stat_ref, pad_ref, *, cin):
    """MaxPool2d(2) + conv1 (raw) + BN1 partial statistics."""
    # x_ref: (1, Hp, 2, Wp, 2*cin) -- the 2x2 pooling window exposed by a
    # metadata-only reshape in the wrapper; the pooling itself happens in VMEM.
    top = x_ref[0, :, 0, :, :]                              # (Hp, Wp, 2*cin)
    bot = x_ref[0, :, 1, :, :]
    hmax = jnp.maximum(top, bot)
    pooled = jnp.maximum(hmax[:, :, :cin], hmax[:, :, cin:])  # (Hp, Wp, cin)

    acc = _conv3x3_im2col(pooled, pad_ref, w_ref)
    _store_conv_and_stats(acc, y_ref, stat_ref)


def _bn_relu_conv_kernel(x_ref, scale_ref, shift_ref, w_ref, y_ref, stat_ref,
                         pad_ref):
    """BN1 (folded scale/shift) + ReLU + conv2 (raw) + BN2 partial statistics."""
    x = x_ref[0]                                            # (Hp, Wp, Cp)
    s = scale_ref[...].reshape(1, 1, -1)
    t = shift_ref[...].reshape(1, 1, -1)
    feat = jnp.maximum(x * s + t, 0.0)

    acc = _conv3x3_im2col(feat, pad_ref, w_ref)
    _store_conv_and_stats(acc, y_ref, stat_ref)


def _bn_relu_kernel(x_ref, scale_ref, shift_ref, o_ref):
    """Final BN2 (folded scale/shift) + ReLU; lane-dense (Cp) output."""
    x = x_ref[0]
    s = scale_ref[...].reshape(1, 1, -1)
    t = shift_ref[...].reshape(1, 1, -1)
    o_ref[0] = jnp.maximum(x * s + t, 0.0).astype(o_ref.dtype)


# ---------------------------------------------------------------------------
# tiny host-side per-channel math between passes
# ---------------------------------------------------------------------------
def _bn_scale_shift(stats, gamma_p, beta_p, count):
    """Fold training-mode BatchNorm into y*scale + shift (per channel)."""
    s = jnp.sum(stats[:, 0, :], axis=0)                     # (Cp,)
    ss = jnp.sum(stats[:, 1, :], axis=0)
    mean = s / count
    var = jnp.maximum(ss / count - mean * mean, 0.0)        # biased variance
    scale = gamma_p * jax.lax.rsqrt(var + EPS)
    shift = beta_p - mean * scale
    return scale.reshape(1, -1), shift.reshape(1, -1)


# ---------------------------------------------------------------------------
# wrapper
# ---------------------------------------------------------------------------
def downsampl_forward(x_nchw, params):
    """Forward pass of Downsampl. x_nchw: (N, Cin, H, W) -> (N, Cout, H//2, W//2)."""
    N, Cin, H, W = x_nchw.shape
    assert H % 2 == 0 and W % 2 == 0, "MaxPool2d(2) expects even H, W here"
    Hp, Wp = H // 2, W // 2
    Cout = params["w1"].shape[-1]
    Cp = _round_up(Cout, LANE)                              # lane-dense channels
    f32 = jnp.float32

    # ---- parameter preparation (tiny, once per call) -----------------------
    # conv1 weight (3,3,Cin,Cout) HWIO -> (9*Cin, Cp), Cout zero-padded
    w1 = params["w1"].astype(f32).reshape(9 * Cin, Cout)
    w1p = jnp.zeros((9 * Cin, Cp), f32).at[:, :Cout].set(w1)
    # conv2 weight (3,3,Cout,Cout) -> pad both channel dims to Cp -> (9*Cp, Cp)
    w2 = params["w2"].astype(f32)
    w2p = (jnp.zeros((3, 3, Cp, Cp), f32)
           .at[:, :, :Cout, :Cout].set(w2)
           .reshape(9 * Cp, Cp))

    def padvec(v):
        return jnp.zeros((Cp,), f32).at[:Cout].set(v.astype(f32).reshape(-1))

    g1, be1 = padvec(params["g1"]), padvec(params["beta1"])
    g2, be2 = padvec(params["g2"]), padvec(params["beta2"])
    # NOTE: conv biases b1/b2 cancel exactly in training-mode BatchNorm
    # (acc + b - mean(acc + b) == acc - mean(acc)) so the kernels ignore them.

    # layout glue: NCHW -> NHWC (one transpose), then a *free* metadata-only
    # reshape exposing the 2x2 pooling window -- no extra HBM traffic.
    x_nhwc = jnp.transpose(x_nchw, (0, 2, 3, 1)).astype(f32)
    x_win = x_nhwc.reshape(N, Hp, 2, Wp, 2 * Cin)

    cparams = pltpu.CompilerParams(
        dimension_semantics=("parallel",),
        vmem_limit_bytes=32 * 1024 * 1024,
    )
    count = float(N * Hp * Wp)

    # ---- pass 1: maxpool + conv1 (raw) + per-batch BN1 partial stats -------
    y1_raw, stats1 = pl.pallas_call(
        functools.partial(_pool_conv_kernel, cin=Cin),
        grid=(N,),
        in_specs=[
            pl.BlockSpec((1, Hp, 2, Wp, 2 * Cin), lambda n: (n, 0, 0, 0, 0)),
            pl.BlockSpec((9 * Cin, Cp), lambda n: (0, 0)),
        ],
        out_specs=(
            pl.BlockSpec((1, Hp, Wp, Cp), lambda n: (n, 0, 0, 0)),
            pl.BlockSpec((1, 2, Cp), lambda n: (n, 0, 0)),
        ),
        out_shape=(
            jax.ShapeDtypeStruct((N, Hp, Wp, Cp), f32),
            jax.ShapeDtypeStruct((N, 2, Cp), f32),
        ),
        scratch_shapes=[pltpu.VMEM((Hp + 2, Wp + 2, Cin), f32)],
        compiler_params=cparams,
    )(x_win, w1p)

    scale1, shift1 = _bn_scale_shift(stats1, g1, be1, count)

    # ---- pass 2: BN1+ReLU (folded) + conv2 (raw) + BN2 partial stats -------
    y2_raw, stats2 = pl.pallas_call(
        _bn_relu_conv_kernel,
        grid=(N,),
        in_specs=[
            pl.BlockSpec((1, Hp, Wp, Cp), lambda n: (n, 0, 0, 0)),
            pl.BlockSpec((1, Cp), lambda n: (0, 0)),
            pl.BlockSpec((1, Cp), lambda n: (0, 0)),
            pl.BlockSpec((9 * Cp, Cp), lambda n: (0, 0)),
        ],
        out_specs=(
            pl.BlockSpec((1, Hp, Wp, Cp), lambda n: (n, 0, 0, 0)),
            pl.BlockSpec((1, 2, Cp), lambda n: (n, 0, 0)),
        ),
        out_shape=(
            jax.ShapeDtypeStruct((N, Hp, Wp, Cp), f32),
            jax.ShapeDtypeStruct((N, 2, Cp), f32),
        ),
        scratch_shapes=[pltpu.VMEM((Hp + 2, Wp + 2, Cp), f32)],
        compiler_params=cparams,
    )(y1_raw, scale1, shift1, w2p)

    scale2, shift2 = _bn_scale_shift(stats2, g2, be2, count)

    # ---- pass 3: BN2 + ReLU, lane-dense output ------------------------------
    out_p = pl.pallas_call(
        _bn_relu_kernel,
        grid=(N,),
        in_specs=[
            pl.BlockSpec((1, Hp, Wp, Cp), lambda n: (n, 0, 0, 0)),
            pl.BlockSpec((1, Cp), lambda n: (0, 0)),
            pl.BlockSpec((1, Cp), lambda n: (0, 0)),
        ],
        out_specs=pl.BlockSpec((1, Hp, Wp, Cp), lambda n: (n, 0, 0, 0)),
        out_shape=jax.ShapeDtypeStruct((N, Hp, Wp, Cp), x_nchw.dtype),
        compiler_params=cparams,
    )(y2_raw, scale2, shift2)

    # drop the channel padding and go back to NCHW (wrapper glue)
    return jnp.transpose(out_p[:, :, :, :Cout], (0, 3, 1, 2))


# ---------------- pure-JAX reference (for validation only) -------------------
def _reference(x_nchw, p):
    x = jax.lax.reduce_window(x_nchw, -jnp.inf, jax.lax.max,
                              (1, 1, 2, 2), (1, 1, 2, 2), 'VALID')

    def conv_bn_relu(x, w_hwio, b, g, beta):
        w_oihw = jnp.transpose(w_hwio, (3, 2, 0, 1))
        y = jax.lax.conv_general_dilated(
            x, w_oihw, (1, 1), ((1, 1), (1, 1)),
            dimension_numbers=('NCHW', 'OIHW', 'NCHW'),
            precision=jax.lax.Precision.HIGHEST)
        y = y + b.reshape(1, -1, 1, 1)
        mean = jnp.mean(y, axis=(0, 2, 3), keepdims=True)
        var = jnp.mean((y - mean) ** 2, axis=(0, 2, 3), keepdims=True)
        y = (y - mean) * jax.lax.rsqrt(var + EPS) * g.reshape(1, -1, 1, 1) \
            + beta.reshape(1, -1, 1, 1)
        return jnp.maximum(y, 0.0)

    x = conv_bn_relu(x, p["w1"], p["b1"], p["g1"], p["beta1"])
    x = conv_bn_relu(x, p["w2"], p["b2"], p["g2"], p["beta2"])
    return x


if __name__ == "__main__":
    key = jax.random.PRNGKey(0)
    N, Cin, Cout, H, W = 2, 4, 8, 16, 16
    ks = jax.random.split(key, 9)

    x = jax.random.normal(ks[0], (N, Cin, H, W), jnp.float32)
    # deterministic synthetic parameters (PyTorch OIHW weights correspond to
    # these HWIO weights via transpose(2, 3, 1, 0))
    params = {
        "w1":    0.2 * jax.random.normal(ks[1], (3, 3, Cin, Cout), jnp.float32),
        "b1":    0.1 * jax.random.normal(ks[2], (1, Cout), jnp.float32),
        "g1":    1.0 + 0.1 * jax.random.normal(ks[3], (1, Cout), jnp.float32),
        "beta1": 0.1 * jax.random.normal(ks[4], (1, Cout), jnp.float32),
        "w2":    0.2 * jax.random.normal(ks[5], (3, 3, Cout, Cout), jnp.float32),
        "b2":    0.1 * jax.random.normal(ks[6], (1, Cout), jnp.float32),
        "g2":    1.0 + 0.1 * jax.random.normal(ks[7], (1, Cout), jnp.float32),
        "beta2": 0.1 * jax.random.normal(ks[8], (1, Cout), jnp.float32),
    }

    fwd = jax.jit(downsampl_forward)
    out = jax.block_until_ready(fwd(x, params))
    ref = jax.block_until_ready(_reference(x, params))

    assert out.shape == (N, Cout, H // 2, W // 2), out.shape
    err = float(jnp.max(jnp.abs(out - ref)))
    # typical error is ~1e-5; 2e-2 is a safety margin for MXU f32 pass rounding
    assert err < 2e-2, err
    print("KERNEL_OK")
</pallas_src>

<mosaic_0001>
module attributes {stable_mosaic.version = 11 : i64} {
  func.func @_pool_conv_kernel(%arg0: i32, %arg1: memref<1x8x2x8x8xf32, #tpu.memory_space<vmem>>, %arg2: memref<36x128xf32, #tpu.memory_space<vmem>>, %arg3: memref<1x8x8x128xf32, #tpu.memory_space<vmem>>, %arg4: memref<1x2x128xf32, #tpu.memory_space<vmem>>, %arg5: memref<10x10x4xf32, #tpu.memory_space<vmem>>) attributes {dimension_semantics = [#tpu.dimension_semantics<parallel>], iteration_bounds = array<i64: 2>, scalar_prefetch = 0 : i64, scratch_operands = 1 : i64, tpu.core_type = #tpu.core_type<tc>, window_params = [{transform_indices = @transform_0, window_bounds = array<i64: 1, 8, 2, 8, 8>}, {pipeline_mode = #tpu.pipeline_mode<synchronous>, transform_indices = @transform_1, window_bounds = array<i64: 36, 128>}, {transform_indices = @transform_2, window_bounds = array<i64: 1, 8, 8, 128>}, {transform_indices = @transform_3, window_bounds = array<i64: 1, 2, 128>}]} {
    %c0 = arith.constant 0 : index
    %c0_0 = arith.constant 0 : index
    %c0_1 = arith.constant 0 : index
    %c0_2 = arith.constant 0 : index
    %c0_3 = arith.constant 0 : index
    %0 = vector.load %arg1[%c0, %c0_0, %c0_1, %c0_2, %c0_3] : memref<1x8x2x8x8xf32, #tpu.memory_space<vmem>>, vector<1x8x1x8x8xf32>
    %1 = vector.shape_cast %0 : vector<1x8x1x8x8xf32> to vector<8x8x8xf32>
    %c0_4 = arith.constant 0 : index
    %c0_5 = arith.constant 0 : index
    %c1 = arith.constant 1 : index
    %c0_6 = arith.constant 0 : index
    %c0_7 = arith.constant 0 : index
    %2 = vector.load %arg1[%c0_4, %c0_5, %c1, %c0_6, %c0_7] : memref<1x8x2x8x8xf32, #tpu.memory_space<vmem>>, vector<1x8x1x8x8xf32>
    %3 = vector.shape_cast %2 : vector<1x8x1x8x8xf32> to vector<8x8x8xf32>
    %4 = arith.maximumf %1, %3 : vector<8x8x8xf32>
    %5 = vector.extract_strided_slice %4 {offsets = [0, 0, 0], sizes = [8, 8, 4], strides = [1, 1, 1]} : vector<8x8x8xf32> to vector<8x8x4xf32>
    %6 = vector.extract_strided_slice %4 {offsets = [0, 0, 4], sizes = [8, 8, 4], strides = [1, 1, 1]} : vector<8x8x8xf32> to vector<8x8x4xf32>
    %7 = arith.maximumf %5, %6 : vector<8x8x4xf32>
    %cst = arith.constant 0.000000e+00 : f32
    %8 = vector.broadcast %cst : f32 to vector<1x10x4xf32>
    %cst_8 = arith.constant 0.000000e+00 : f32
    %9 = vector.broadcast %cst_8 : f32 to vector<8x1x4xf32>
    %c0_9 = arith.constant 0 : index
    %c0_10 = arith.constant 0 : index
    %c0_11 = arith.constant 0 : index
    %10 = vector.load %arg5[%c0_9, %c0_10, %c0_11] : memref<10x10x4xf32, #tpu.memory_space<vmem>>, vector<1x10x4xf32>
    tpu.vector_store %arg5[%c0_9, %c0_10, %c0_11], %8 {strides = array<i32>} : memref<10x10x4xf32, #tpu.memory_space<vmem>>, vector<1x10x4xf32>,
    %c9 = arith.constant 9 : index
    %c0_12 = arith.constant 0 : index
    %c0_13 = arith.constant 0 : index
    %11 = vector.load %arg5[%c9, %c0_12, %c0_13] : memref<10x10x4xf32, #tpu.memory_space<vmem>>, vector<1x10x4xf32>
    tpu.vector_store %arg5[%c9, %c0_12, %c0_13], %8 {strides = array<i32>} : memref<10x10x4xf32, #tpu.memory_space<vmem>>, vector<1x10x4xf32>,
    %c1_14 = arith.constant 1 : index
    %c0_15 = arith.constant 0 : index
    %c0_16 = arith.constant 0 : index
    %12 = vector.load %arg5[%c1_14, %c0_15, %c0_16] : memref<10x10x4xf32, #tpu.memory_space<vmem>>, vector<8x1x4xf32>
    tpu.vector_store %arg5[%c1_14, %c0_15, %c0_16], %9 {strides = array<i32>} : memref<10x10x4xf32, #tpu.memory_space<vmem>>, vector<8x1x4xf32>,
    %c1_17 = arith.constant 1 : index
    %c9_18 = arith.constant 9 : index
    %c0_19 = arith.constant 0 : index
    %13 = vector.load %arg5[%c1_17, %c9_18, %c0_19] : memref<10x10x4xf32, #tpu.memory_space<vmem>>, vector<8x1x4xf32>
    tpu.vector_store %arg5[%c1_17, %c9_18, %c0_19], %9 {strides = array<i32>} : memref<10x10x4xf32, #tpu.memory_space<vmem>>, vector<8x1x4xf32>,
    %c1_20 = arith.constant 1 : index
    %c1_21 = arith.constant 1 : index
    %c0_22 = arith.constant 0 : index
    %14 = vector.load %arg5[%c1_20, %c1_21, %c0_22] : memref<10x10x4xf32, #tpu.memory_space<vmem>>, vector<8x8x4xf32>
    tpu.vector_store %arg5[%c1_20, %c1_21, %c0_22], %7 {strides = array<i32>} : memref<10x10x4xf32, #tpu.memory_space<vmem>>, vector<8x8x4xf32>,
    %c0_23 = arith.constant 0 : index
    %c0_24 = arith.constant 0 : index
    %c0_25 = arith.constant 0 : index
    %15 = vector.load %arg5[%c0_23, %c0_24, %c0_25] : memref<10x10x4xf32, #tpu.memory_space<vmem>>, vector<8x8x4xf32>
    %16 = vector.shape_cast %15 : vector<8x8x4xf32> to vector<64x4xf32>
    %c0_26 = arith.constant 0 : index
    %c1_27 = arith.constant 1 : index
    %c0_28 = arith.constant 0 : index
    %17 = vector.load %arg5[%c0_26, %c1_27, %c0_28] : memref<10x10x4xf32, #tpu.memory_space<vmem>>, vector<8x8x4xf32>
    %18 = vector.shape_cast %17 : vector<8x8x4xf32> to vector<64x4xf32>
    %c0_29 = arith.constant 0 : index
    %c2 = arith.constant 2 : index
    %c0_30 = arith.constant 0 : index
    %19 = vector.load %arg5[%c0_29, %c2, %c0_30] : memref<10x10x4xf32, #tpu.memory_space<vmem>>, vector<8x8x4xf32>
    %20 = vector.shape_cast %19 : vector<8x8x4xf32> to vector<64x4xf32>
    %c1_31 = arith.constant 1 : index
    %c0_32 = arith.constant 0 : index
    %c0_33 = arith.constant 0 : index
    %21 = vector.load %arg5[%c1_31, %c0_32, %c0_33] : memref<10x10x4xf32, #tpu.memory_space<vmem>>, vector<8x8x4xf32>
    %22 = vector.shape_cast %21 : vector<8x8x4xf32> to vector<64x4xf32>
    %c1_34 = arith.constant 1 : index
    %c1_35 = arith.constant 1 : index
    %c0_36 = arith.constant 0 : index
    %23 = vector.load %arg5[%c1_34, %c1_35, %c0_36] : memref<10x10x4xf32, #tpu.memory_space<vmem>>, vector<8x8x4xf32>
    %24 = vector.shape_cast %23 : vector<8x8x4xf32> to vector<64x4xf32>
    %c1_37 = arith.constant 1 : index
    %c2_38 = arith.constant 2 : index
    %c0_39 = arith.constant 0 : index
    %25 = vector.load %arg5[%c1_37, %c2_38, %c0_39] : memref<10x10x4xf32, #tpu.memory_space<vmem>>, vector<8x8x4xf32>
    %26 = vector.shape_cast %25 : vector<8x8x4xf32> to vector<64x4xf32>
    %c2_40 = arith.constant 2 : index
    %c0_41 = arith.constant 0 : index
    %c0_42 = arith.constant 0 : index
    %27 = vector.load %arg5[%c2_40, %c0_41, %c0_42] : memref<10x10x4xf32, #tpu.memory_space<vmem>>, vector<8x8x4xf32>
    %28 = vector.shape_cast %27 : vector<8x8x4xf32> to vector<64x4xf32>
    %c2_43 = arith.constant 2 : index
    %c1_44 = arith.constant 1 : index
    %c0_45 = arith.constant 0 : index
    %29 = vector.load %arg5[%c2_43, %c1_44, %c0_45] : memref<10x10x4xf32, #tpu.memory_space<vmem>>, vector<8x8x4xf32>
    %30 = vector.shape_cast %29 : vector<8x8x4xf32> to vector<64x4xf32>
    %c2_46 = arith.constant 2 : index
    %c2_47 = arith.constant 2 : index
    %c0_48 = arith.constant 0 : index
    %31 = vector.load %arg5[%c2_46, %c2_47, %c0_48] : memref<10x10x4xf32, #tpu.memory_space<vmem>>, vector<8x8x4xf32>
    %32 = vector.shape_cast %31 : vector<8x8x4xf32> to vector<64x4xf32>
    %33 = tpu.concatenate %16, %18, %20, %22, %24, %26, %28, %30, %32 in 1 : vector<64x4xf32>, vector<64x4xf32>, vector<64x4xf32>, vector<64x4xf32>, vector<64x4xf32>, vector<64x4xf32>, vector<64x4xf32>, vector<64x4xf32>, vector<64x4xf32> -> vector<64x36xf32>
    %c0_49 = arith.constant 0 : index
    %c0_50 = arith.constant 0 : index
    %34 = vector.load %arg2[%c0_49, %c0_50] : memref<36x128xf32, #tpu.memory_space<vmem>>, vector<36x128xf32>
    %cst_51 = arith.constant dense<0.000000e+00> : vector<64x128xf32>
    %35 = tpu.matmul %33, %34, %cst_51 {dimension_numbers = #tpu.dot_dimension_numbers<[1], [0], [0], [1], [0, 0, 1, 1], [], []>} : vector<64x36xf32>, vector<36x128xf32>, vector<64x128xf32> -> vector<64x128xf32>
    %36 = vector.shape_cast %35 : vector<64x128xf32> to vector<8x8x128xf32>
    %c0_52 = arith.constant 0 : index
    %c0_53 = arith.constant 0 : index
    %c0_54 = arith.constant 0 : index
    %c0_55 = arith.constant 0 : index
    %37 = vector.load %arg3[%c0_52, %c0_53, %c0_54, %c0_55] : memref<1x8x8x128xf32, #tpu.memory_space<vmem>>, vector<1x8x8x128xf32>
    %38 = vector.shape_cast %37 : vector<1x8x8x128xf32> to vector<8x8x128xf32>
    %39 = vector.shape_cast %36 : vector<8x8x128xf32> to vector<1x8x8x128xf32>
    tpu.vector_store %arg3[%c0_52, %c0_53, %c0_54, %c0_55], %39 {strides = array<i32>} : memref<1x8x8x128xf32, #tpu.memory_space<vmem>>, vector<1x8x8x128xf32>,
    %cst_56 = arith.constant dense<0.000000e+00> : vector<128xf32>
    %40 = vector.multi_reduction <add>, %35, %cst_56 [0] : vector<64x128xf32> to vector<128xf32>
    %41 = vector.shape_cast %40 : vector<128xf32> to vector<1x128xf32>
    %c0_57 = arith.constant 0 : index
    %c0_58 = arith.constant 0 : index
    %c0_59 = arith.constant 0 : index
    %42 = vector.load %arg4[%c0_57, %c0_58, %c0_59] : memref<1x2x128xf32, #tpu.memory_space<vmem>>, vector<1x1x128xf32>
    %43 = vector.shape_cast %42 : vector<1x1x128xf32> to vector<1x128xf32>
    %44 = vector.shape_cast %41 : vector<1x128xf32> to vector<1x1x128xf32>
    tpu.vector_store %arg4[%c0_57, %c0_58, %c0_59], %44 {strides = array<i32>} : memref<1x2x128xf32, #tpu.memory_space<vmem>>, vector<1x1x128xf32>,
    %45 = arith.mulf %35, %35 : vector<64x128xf32>
    %cst_60 = arith.constant dense<0.000000e+00> : vector<128xf32>
    %46 = vector.multi_reduction <add>, %45, %cst_60 [0] : vector<64x128xf32> to vector<128xf32>
    %47 = vector.shape_cast %46 : vector<128xf32> to vector<1x128xf32>
    %c0_61 = arith.constant 0 : index
    %c1_62 = arith.constant 1 : index
    %c0_63 = arith.constant 0 : index
    %48 = vector.load %arg4[%c0_61, %c1_62, %c0_63] : memref<1x2x128xf32, #tpu.memory_space<vmem>>, vector<1x1x128xf32>
    %49 = vector.shape_cast %48 : vector<1x1x128xf32> to vector<1x128xf32>
    %50 = vector.shape_cast %47 : vector<1x128xf32> to vector<1x1x128xf32>
    tpu.vector_store %arg4[%c0_61, %c1_62, %c0_63], %50 {strides = array<i32>} : memref<1x2x128xf32, #tpu.memory_space<vmem>>, vector<1x1x128xf32>,
    return
  }
  func.func @transform_0(%arg0: i32) -> (i32, i32, i32, i32, i32) {
    %c0_i32 = arith.constant 0 : i32
    %c0_i32_0 = arith.constant 0 : i32
    %c0_i32_1 = arith.constant 0 : i32
    %c0_i32_2 = arith.constant 0 : i32
    %c0_i32_3 = arith.constant 0 : i32
    return %arg0, %c0_i32, %c0_i32_0, %c0_i32_1, %c0_i32_2 : i32, i32, i32, i32, i32
  }
  func.func @transform_1(%arg0: i32) -> (i32, i32) {
    %c0_i32 = arith.constant 0 : i32
    %c0_i32_0 = arith.constant 0 : i32
    %c0_i32_1 = arith.constant 0 : i32
    return %c0_i32, %c0_i32_0 : i32, i32
  }
  func.func @transform_2(%arg0: i32) -> (i32, i32, i32, i32) {
    %c0_i32 = arith.constant 0 : i32
    %c0_i32_0 = arith.constant 0 : i32
    %c0_i32_1 = arith.constant 0 : i32
    %c0_i32_2 = arith.constant 0 : i32
    return %arg0, %c0_i32, %c0_i32_0, %c0_i32_1 : i32, i32, i32, i32
  }
  func.func @transform_3(%arg0: i32) -> (i32, i32, i32) {
    %c0_i32 = arith.constant 0 : i32
    %c0_i32_0 = arith.constant 0 : i32
    %c0_i32_1 = arith.constant 0 : i32
    return %arg0, %c0_i32, %c0_i32_0 : i32, i32, i32
  }
}

module attributes {stable_mosaic.version = 11 : i64} {
  func.func @_bn_relu_conv_kernel(%arg0: i32, %arg1: memref<1x8x8x128xf32, #tpu.memory_space<vmem>>, %arg2: memref<1x128xf32, #tpu.memory_space<vmem>>, %arg3: memref<1x128xf32, #tpu.memory_space<vmem>>, %arg4: memref<1152x128xf32, #tpu.memory_space<vmem>>, %arg5: memref<1x8x8x128xf32, #tpu.memory_space<vmem>>, %arg6: memref<1x2x128xf32, #tpu.memory_space<vmem>>, %arg7: memref<10x10x128xf32, #tpu.memory_space<vmem>>) attributes {dimension_semantics = [#tpu.dimension_semantics<parallel>], iteration_bounds = array<i64: 2>, scalar_prefetch = 0 : i64, scratch_operands = 1 : i64, tpu.core_type = #tpu.core_type<tc>, window_params = [{transform_indices = @transform_0, window_bounds = array<i64: 1, 8, 8, 128>}, {pipeline_mode = #tpu.pipeline_mode<synchronous>, transform_indices = @transform_1, window_bounds = array<i64: 1, 128>}, {pipeline_mode = #tpu.pipeline_mode<synchronous>, transform_indices = @transform_2, window_bounds = array<i64: 1, 128>}, {pipeline_mode = #tpu.pipeline_mode<synchronous>, transform_indices = @transform_3, window_bounds = array<i64: 1152, 128>}, {transform_indices = @transform_4, window_bounds = array<i64: 1, 8, 8, 128>}, {transform_indices = @transform_5, window_bounds = array<i64: 1, 2, 128>}]} {
    %c0 = arith.constant 0 : index
    %c0_0 = arith.constant 0 : index
    %c0_1 = arith.constant 0 : index
    %c0_2 = arith.constant 0 : index
    %0 = vector.load %arg1[%c0, %c0_0, %c0_1, %c0_2] : memref<1x8x8x128xf32, #tpu.memory_space<vmem>>, vector<1x8x8x128xf32>
    %1 = vector.shape_cast %0 : vector<1x8x8x128xf32> to vector<8x8x128xf32>
    %c0_3 = arith.constant 0 : index
    %c0_4 = arith.constant 0 : index
    %2 = vector.load %arg2[%c0_3, %c0_4] : memref<1x128xf32, #tpu.memory_space<vmem>>, vector<1x128xf32>
    %3 = vector.shape_cast %2 : vector<1x128xf32> to vector<1x1x128xf32>
    %c0_5 = arith.constant 0 : index
    %c0_6 = arith.constant 0 : index
    %4 = vector.load %arg3[%c0_5, %c0_6] : memref<1x128xf32, #tpu.memory_space<vmem>>, vector<1x128xf32>
    %5 = vector.shape_cast %4 : vector<1x128xf32> to vector<1x1x128xf32>
    %6 = vector.broadcast %3 : vector<1x1x128xf32> to vector<8x8x128xf32>
    %7 = arith.mulf %1, %6 : vector<8x8x128xf32>
    %8 = vector.broadcast %5 : vector<1x1x128xf32> to vector<8x8x128xf32>
    %9 = arith.addf %7, %8 : vector<8x8x128xf32>
    %cst = arith.constant 0.000000e+00 : f32
    %10 = vector.broadcast %cst : f32 to vector<8x8x128xf32>
    %11 = arith.maximumf %9, %10 : vector<8x8x128xf32>
    %cst_7 = arith.constant 0.000000e+00 : f32
    %12 = vector.broadcast %cst_7 : f32 to vector<1x10x128xf32>
    %cst_8 = arith.constant 0.000000e+00 : f32
    %13 = vector.broadcast %cst_8 : f32 to vector<8x1x128xf32>
    %c0_9 = arith.constant 0 : index
    %c0_10 = arith.constant 0 : index
    %c0_11 = arith.constant 0 : index
    %14 = vector.load %arg7[%c0_9, %c0_10, %c0_11] : memref<10x10x128xf32, #tpu.memory_space<vmem>>, vector<1x10x128xf32>
    tpu.vector_store %arg7[%c0_9, %c0_10, %c0_11], %12 {strides = array<i32>} : memref<10x10x128xf32, #tpu.memory_space<vmem>>, vector<1x10x128xf32>,
    %c9 = arith.constant 9 : index
    %c0_12 = arith.constant 0 : index
    %c0_13 = arith.constant 0 : index
    %15 = vector.load %arg7[%c9, %c0_12, %c0_13] : memref<10x10x128xf32, #tpu.memory_space<vmem>>, vector<1x10x128xf32>
    tpu.vector_store %arg7[%c9, %c0_12, %c0_13], %12 {strides = array<i32>} : memref<10x10x128xf32, #tpu.memory_space<vmem>>, vector<1x10x128xf32>,
    %c1 = arith.constant 1 : index
    %c0_14 = arith.constant 0 : index
    %c0_15 = arith.constant 0 : index
    %16 = vector.load %arg7[%c1, %c0_14, %c0_15] : memref<10x10x128xf32, #tpu.memory_space<vmem>>, vector<8x1x128xf32>
    tpu.vector_store %arg7[%c1, %c0_14, %c0_15], %13 {strides = array<i32>} : memref<10x10x128xf32, #tpu.memory_space<vmem>>, vector<8x1x128xf32>,
    %c1_16 = arith.constant 1 : index
    %c9_17 = arith.constant 9 : index
    %c0_18 = arith.constant 0 : index
    %17 = vector.load %arg7[%c1_16, %c9_17, %c0_18] : memref<10x10x128xf32, #tpu.memory_space<vmem>>, vector<8x1x128xf32>
    tpu.vector_store %arg7[%c1_16, %c9_17, %c0_18], %13 {strides = array<i32>} : memref<10x10x128xf32, #tpu.memory_space<vmem>>, vector<8x1x128xf32>,
    %c1_19 = arith.constant 1 : index
    %c1_20 = arith.constant 1 : index
    %c0_21 = arith.constant 0 : index
    %18 = vector.load %arg7[%c1_19, %c1_20, %c0_21] : memref<10x10x128xf32, #tpu.memory_space<vmem>>, vector<8x8x128xf32>
    tpu.vector_store %arg7[%c1_19, %c1_20, %c0_21], %11 {strides = array<i32>} : memref<10x10x128xf32, #tpu.memory_space<vmem>>, vector<8x8x128xf32>,
    %c0_22 = arith.constant 0 : index
    %c0_23 = arith.constant 0 : index
    %c0_24 = arith.constant 0 : index
    %19 = vector.load %arg7[%c0_22, %c0_23, %c0_24] : memref<10x10x128xf32, #tpu.memory_space<vmem>>, vector<8x8x128xf32>
    %20 = vector.shape_cast %19 : vector<8x8x128xf32> to vector<64x128xf32>
    %c0_25 = arith.constant 0 : index
    %c1_26 = arith.constant 1 : index
    %c0_27 = arith.constant 0 : index
    %21 = vector.load %arg7[%c0_25, %c1_26, %c0_27] : memref<10x10x128xf32, #tpu.memory_space<vmem>>, vector<8x8x128xf32>
    %22 = vector.shape_cast %21 : vector<8x8x128xf32> to vector<64x128xf32>
    %c0_28 = arith.constant 0 : index
    %c2 = arith.constant 2 : index
    %c0_29 = arith.constant 0 : index
    %23 = vector.load %arg7[%c0_28, %c2, %c0_29] : memref<10x10x128xf32, #tpu.memory_space<vmem>>, vector<8x8x128xf32>
    %24 = vector.shape_cast %23 : vector<8x8x128xf32> to vector<64x128xf32>
    %c1_30 = arith.constant 1 : index
    %c0_31 = arith.constant 0 : index
    %c0_32 = arith.constant 0 : index
    %25 = vector.load %arg7[%c1_30, %c0_31, %c0_32] : memref<10x10x128xf32, #tpu.memory_space<vmem>>, vector<8x8x128xf32>
    %26 = vector.shape_cast %25 : vector<8x8x128xf32> to vector<64x128xf32>
    %c1_33 = arith.constant 1 : index
    %c1_34 = arith.constant 1 : index
    %c0_35 = arith.constant 0 : index
    %27 = vector.load %arg7[%c1_33, %c1_34, %c0_35] : memref<10x10x128xf32, #tpu.memory_space<vmem>>, vector<8x8x128xf32>
    %28 = vector.shape_cast %27 : vector<8x8x128xf32> to vector<64x128xf32>
    %c1_36 = arith.constant 1 : index
    %c2_37 = arith.constant 2 : index
    %c0_38 = arith.constant 0 : index
    %29 = vector.load %arg7[%c1_36, %c2_37, %c0_38] : memref<10x10x128xf32, #tpu.memory_space<vmem>>, vector<8x8x128xf32>
    %30 = vector.shape_cast %29 : vector<8x8x128xf32> to vector<64x128xf32>
    %c2_39 = arith.constant 2 : index
    %c0_40 = arith.constant 0 : index
    %c0_41 = arith.constant 0 : index
    %31 = vector.load %arg7[%c2_39, %c0_40, %c0_41] : memref<10x10x128xf32, #tpu.memory_space<vmem>>, vector<8x8x128xf32>
    %32 = vector.shape_cast %31 : vector<8x8x128xf32> to vector<64x128xf32>
    %c2_42 = arith.constant 2 : index
    %c1_43 = arith.constant 1 : index
    %c0_44 = arith.constant 0 : index
    %33 = vector.load %arg7[%c2_42, %c1_43, %c0_44] : memref<10x10x128xf32, #tpu.memory_space<vmem>>, vector<8x8x128xf32>
    %34 = vector.shape_cast %33 : vector<8x8x128xf32> to vector<64x128xf32>
    %c2_45 = arith.constant 2 : index
    %c2_46 = arith.constant 2 : index
    %c0_47 = arith.constant 0 : index
    %35 = vector.load %arg7[%c2_45, %c2_46, %c0_47] : memref<10x10x128xf32, #tpu.memory_space<vmem>>, vector<8x8x128xf32>
    %36 = vector.shape_cast %35 : vector<8x8x128xf32> to vector<64x128xf32>
    %37 = tpu.concatenate %20, %22, %24, %26, %28, %30, %32, %34, %36 in 1 : vector<64x128xf32>, vector<64x128xf32>, vector<64x128xf32>, vector<64x128xf32>, vector<64x128xf32>, vector<64x128xf32>, vector<64x128xf32>, vector<64x128xf32>, vector<64x128xf32> -> vector<64x1152xf32>
    %c0_48 = arith.constant 0 : index
    %c0_49 = arith.constant 0 : index
    %38 = vector.load %arg4[%c0_48, %c0_49] : memref<1152x128xf32, #tpu.memory_space<vmem>>, vector<1152x128xf32>
    %cst_50 = arith.constant dense<0.000000e+00> : vector<64x128xf32>
    %39 = tpu.matmul %37, %38, %cst_50 {dimension_numbers = #tpu.dot_dimension_numbers<[1], [0], [0], [1], [0, 0, 1, 1], [], []>} : vector<64x1152xf32>, vector<1152x128xf32>, vector<64x128xf32> -> vector<64x128xf32>
    %40 = vector.shape_cast %39 : vector<64x128xf32> to vector<8x8x128xf32>
    %c0_51 = arith.constant 0 : index
    %c0_52 = arith.constant 0 : index
    %c0_53 = arith.constant 0 : index
    %c0_54 = arith.constant 0 : index
    %41 = vector.load %arg5[%c0_51, %c0_52, %c0_53, %c0_54] : memref<1x8x8x128xf32, #tpu.memory_space<vmem>>, vector<1x8x8x128xf32>
    %42 = vector.shape_cast %41 : vector<1x8x8x128xf32> to vector<8x8x128xf32>
    %43 = vector.shape_cast %40 : vector<8x8x128xf32> to vector<1x8x8x128xf32>
    tpu.vector_store %arg5[%c0_51, %c0_52, %c0_53, %c0_54], %43 {strides = array<i32>} : memref<1x8x8x128xf32, #tpu.memory_space<vmem>>, vector<1x8x8x128xf32>,
    %cst_55 = arith.constant dense<0.000000e+00> : vector<128xf32>
    %44 = vector.multi_reduction <add>, %39, %cst_55 [0] : vector<64x128xf32> to vector<128xf32>
    %45 = vector.shape_cast %44 : vector<128xf32> to vector<1x128xf32>
    %c0_56 = arith.constant 0 : index
    %c0_57 = arith.constant 0 : index
    %c0_58 = arith.constant 0 : index
    %46 = vector.load %arg6[%c0_56, %c0_57, %c0_58] : memref<1x2x128xf32, #tpu.memory_space<vmem>>, vector<1x1x128xf32>
    %47 = vector.shape_cast %46 : vector<1x1x128xf32> to vector<1x128xf32>
    %48 = vector.shape_cast %45 : vector<1x128xf32> to vector<1x1x128xf32>
    tpu.vector_store %arg6[%c0_56, %c0_57, %c0_58], %48 {strides = array<i32>} : memref<1x2x128xf32, #tpu.memory_space<vmem>>, vector<1x1x128xf32>,
    %49 = arith.mulf %39, %39 : vector<64x128xf32>
    %cst_59 = arith.constant dense<0.000000e+00> : vector<128xf32>
    %50 = vector.multi_reduction <add>, %49, %cst_59 [0] : vector<64x128xf32> to vector<128xf32>
    %51 = vector.shape_cast %50 : vector<128xf32> to vector<1x128xf32>
    %c0_60 = arith.constant 0 : index
    %c1_61 = arith.constant 1 : index
    %c0_62 = arith.constant 0 : index
    %52 = vector.load %arg6[%c0_60, %c1_61, %c0_62] : memref<1x2x128xf32, #tpu.memory_space<vmem>>, vector<1x1x128xf32>
    %53 = vector.shape_cast %52 : vector<1x1x128xf32> to vector<1x128xf32>
    %54 = vector.shape_cast %51 : vector<1x128xf32> to vector<1x1x128xf32>
    tpu.vector_store %arg6[%c0_60, %c1_61, %c0_62], %54 {strides = array<i32>} : memref<1x2x128xf32, #tpu.memory_space<vmem>>, vector<1x1x128xf32>,
    return
  }
  func.func @transform_0(%arg0: i32) -> (i32, i32, i32, i32) {
    %c0_i32 = arith.constant 0 : i32
    %c0_i32_0 = arith.constant 0 : i32
    %c0_i32_1 = arith.constant 0 : i32
    %c0_i32_2 = arith.constant 0 : i32
    return %arg0, %c0_i32, %c0_i32_0, %c0_i32_1 : i32, i32, i32, i32
  }
  func.func @transform_1(%arg0: i32) -> (i32, i32) {
    %c0_i32 = arith.constant 0 : i32
    %c0_i32_0 = arith.constant 0 : i32
    %c0_i32_1 = arith.constant 0 : i32
    return %c0_i32, %c0_i32_0 : i32, i32
  }
  func.func @transform_2(%arg0: i32) -> (i32, i32) {
    %c0_i32 = arith.constant 0 : i32
    %c0_i32_0 = arith.constant 0 : i32
    %c0_i32_1 = arith.constant 0 : i32
    return %c0_i32, %c0_i32_0 : i32, i32
  }
  func.func @transform_3(%arg0: i32) -> (i32, i32) {
    %c0_i32 = arith.constant 0 : i32
    %c0_i32_0 = arith.constant 0 : i32
    %c0_i32_1 = arith.constant 0 : i32
    return %c0_i32, %c0_i32_0 : i32, i32
  }
  func.func @transform_4(%arg0: i32) -> (i32, i32, i32, i32) {
    %c0_i32 = arith.constant 0 : i32
    %c0_i32_0 = arith.constant 0 : i32
    %c0_i32_1 = arith.constant 0 : i32
    %c0_i32_2 = arith.constant 0 : i32
    return %arg0, %c0_i32, %c0_i32_0, %c0_i32_1 : i32, i32, i32, i32
  }
  func.func @transform_5(%arg0: i32) -> (i32, i32, i32) {
    %c0_i32 = arith.constant 0 : i32
    %c0_i32_0 = arith.constant 0 : i32
    %c0_i32_1 = arith.constant 0 : i32
    return %arg0, %c0_i32, %c0_i32_0 : i32, i32, i32
  }
}

module attributes {stable_mosaic.version = 11 : i64} {
  func.func @_bn_relu_kernel(%arg0: i32, %arg1: memref<1x8x8x128xf32, #tpu.memory_space<vmem>>, %arg2: memref<1x128xf32, #tpu.memory_space<vmem>>, %arg3: memref<1x128xf32, #tpu.memory_space<vmem>>, %arg4: memref<1x8x8x128xf32, #tpu.memory_space<vmem>>) attributes {dimension_semantics = [#tpu.dimension_semantics<parallel>], iteration_bounds = array<i64: 2>, scalar_prefetch = 0 : i64, scratch_operands = 0 : i64, tpu.core_type = #tpu.core_type<tc>, window_params = [{transform_indices = @transform_0, window_bounds = array<i64: 1, 8, 8, 128>}, {pipeline_mode = #tpu.pipeline_mode<synchronous>, transform_indices = @transform_1, window_bounds = array<i64: 1, 128>}, {pipeline_mode = #tpu.pipeline_mode<synchronous>, transform_indices = @transform_2, window_bounds = array<i64: 1, 128>}, {transform_indices = @transform_3, window_bounds = array<i64: 1, 8, 8, 128>}]} {
    %c0 = arith.constant 0 : index
    %c0_0 = arith.constant 0 : index
    %c0_1 = arith.constant 0 : index
    %c0_2 = arith.constant 0 : index
    %0 = vector.load %arg1[%c0, %c0_0, %c0_1, %c0_2] : memref<1x8x8x128xf32, #tpu.memory_space<vmem>>, vector<1x8x8x128xf32>
    %1 = vector.shape_cast %0 : vector<1x8x8x128xf32> to vector<8x8x128xf32>
    %c0_3 = arith.constant 0 : index
    %c0_4 = arith.constant 0 : index
    %2 = vector.load %arg2[%c0_3, %c0_4] : memref<1x128xf32, #tpu.memory_space<vmem>>, vector<1x128xf32>
    %3 = vector.shape_cast %2 : vector<1x128xf32> to vector<1x1x128xf32>
    %c0_5 = arith.constant 0 : index
    %c0_6 = arith.constant 0 : index
    %4 = vector.load %arg3[%c0_5, %c0_6] : memref<1x128xf32, #tpu.memory_space<vmem>>, vector<1x128xf32>
    %5 = vector.shape_cast %4 : vector<1x128xf32> to vector<1x1x128xf32>
    %6 = vector.broadcast %3 : vector<1x1x128xf32> to vector<8x8x128xf32>
    %7 = arith.mulf %1, %6 : vector<8x8x128xf32>
    %8 = vector.broadcast %5 : vector<1x1x128xf32> to vector<8x8x128xf32>
    %9 = arith.addf %7, %8 : vector<8x8x128xf32>
    %cst = arith.constant 0.000000e+00 : f32
    %10 = vector.broadcast %cst : f32 to vector<8x8x128xf32>
    %11 = arith.maximumf %9, %10 : vector<8x8x128xf32>
    %c0_7 = arith.constant 0 : index
    %c0_8 = arith.constant 0 : index
    %c0_9 = arith.constant 0 : index
    %c0_10 = arith.constant 0 : index
    %12 = vector.load %arg4[%c0_7, %c0_8, %c0_9, %c0_10] : memref<1x8x8x128xf32, #tpu.memory_space<vmem>>, vector<1x8x8x128xf32>
    %13 = vector.shape_cast %12 : vector<1x8x8x128xf32> to vector<8x8x128xf32>
    %14 = vector.shape_cast %11 : vector<8x8x128xf32> to vector<1x8x8x128xf32>
    tpu.vector_store %arg4[%c0_7, %c0_8, %c0_9, %c0_10], %14 {strides = array<i32>} : memref<1x8x8x128xf32, #tpu.memory_space<vmem>>, vector<1x8x8x128xf32>,
    return
  }
  func.func @transform_0(%arg0: i32) -> (i32, i32, i32, i32) {
    %c0_i32 = arith.constant 0 : i32
    %c0_i32_0 = arith.constant 0 : i32
    %c0_i32_1 = arith.constant 0 : i32
    %c0_i32_2 = arith.constant 0 : i32
    return %arg0, %c0_i32, %c0_i32_0, %c0_i32_1 : i32, i32, i32, i32
  }
  func.func @transform_1(%arg0: i32) -> (i32, i32) {
    %c0_i32 = arith.constant 0 : i32
    %c0_i32_0 = arith.constant 0 : i32
    %c0_i32_1 = arith.constant 0 : i32
    return %c0_i32, %c0_i32_0 : i32, i32
  }
  func.func @transform_2(%arg0: i32) -> (i32, i32) {
    %c0_i32 = arith.constant 0 : i32
    %c0_i32_0 = arith.constant 0 : i32
    %c0_i32_1 = arith.constant 0 : i32
    return %c0_i32, %c0_i32_0 : i32, i32
  }
  func.func @transform_3(%arg0: i32) -> (i32, i32, i32, i32) {
    %c0_i32 = arith.constant 0 : i32
    %c0_i32_0 = arith.constant 0 : i32
    %c0_i32_1 = arith.constant 0 : i32
    %c0_i32_2 = arith.constant 0 : i32
    return %arg0, %c0_i32, %c0_i32_0, %c0_i32_1 : i32, i32, i32, i32
  }
}

</mosaic_0001>

<bundles_post_ra>
// kernel: downsampl_forward.5
= control target key start
LH: loop header
LB: loop body
LE: loop exit
PB: predicated region body
PF: predicated region fallthrough
CT: control target
= control target key end

     0   :  { %s331_s12 = smov 0   ;;  %s354_s0 = inlined_call_operand.vmem [shape: f32[2,8,8,128], index: 0, kind: input, shape index: {}]   ;;  %s355_s1 = inlined_call_operand.vmem [shape: f32[1,128], index: 1, kind: input, shape index: {}]   ;;  %s356_s2 = inlined_call_operand.vmem [shape: f32[1,128], index: 2, kind: input, shape index: {}]   ;;  %s357_s3 = inlined_call_operand.vmem [shape: f32[2,8,8,128], index: 3, kind: output, shape index: {}]  }
   0x1 LB: > { %s280_s13 = sadd.s32 4294967295, %s309_s12   ;;  %p284_p0 = scmp.ge.s32.totalorder %s309_s12, 1  ;;  %s309_s12 = sphi %s331_s12, %s13_s12  }
   0x2   : > { %p137_p1 = scmp.lt.s32.totalorder %s309_s12, 3 }
   0x4   : > { %p138_p2 = pnand %p284_p0, %p137_p1 }
   0x5   : > { %p161_p3 = scmp.lt.s32.totalorder (!%p138_p2), %s280_s13, 1  ;;  %v289_v0 = vld [vmem:[%s355_s1] ss:$0 sm:$0xff] (!%p138_p2) }
   0x6   : > { %141 = sbr.rel (%p138_p2) target bundleno = 27 (0x1b), region = 32  ;;  %v290_v1 = vld [vmem:[%s356_s2] ss:$0 sm:$0xff] (!%p138_p2) }
   0xd   : > { %s359_s13 = smov (!%p161_p3, %s280_s13), 1 }
   0xe   : > { %s293_s14 = sshll.u32 %s359_s13, 6 }
   0xf   : > { %s165_s19 = scalar_lea.vmem %s354_s0, %s293_s14  ;;  %s170_s24 = scalar_lea.vmem %s357_s3, %s293_s14 }
  0x10   : > { %v171_v2 = vld [vmem:[%s165_s19] sm:$0xff]  ;;  %v172_v3 = vld [vmem:[%s165_s19 + $0x8] sm:$0xff]  ;;  %v173_v4 = vld [vmem:[%s165_s19 + $0x10] sm:$0xff] }
  0x11   : > { %v187_v5 = vmul.f32 %v289_v0, %v171_v2  ;;  %v188_v6 = vmul.f32 %v289_v0, %v172_v3  ;;  %v189_v7 = vmul.f32 %v289_v0, %v173_v4  ;;  %v174_v8 = vld [vmem:[%s165_s19 + $0x18] sm:$0xff]  ;;  %v175_v9 = vld [vmem:[%s165_s19 + $0x20] sm:$0xff]  ;;  %v176_v10 = vld [vmem:[%s165_s19 + $0x28] sm:$0xff] }
  0x12   : > { %v190_v11 = vmul.f32 %v289_v0, %v174_v8  ;;  %v191_v12 = vmul.f32 %v289_v0, %v175_v9  ;;  %v192_v13 = vmul.f32 %v289_v0, %v176_v10  ;;  %v177_v14 = vld [vmem:[%s165_s19 + $0x30] sm:$0xff]  ;;  %v178_v15 = vld [vmem:[%s165_s19 + $0x38] sm:$0xff] }
  0x13   : > { %v201_v16 = vadd.f32 %v290_v1, %v187_v5  ;;  %v202_v17 = vadd.f32 %v290_v1, %v188_v6  ;;  %v203_v18 = vadd.f32 %v290_v1, %v189_v7  ;;  %v193_v19 = vmul.f32 %v289_v0, %v177_v14 }
  0x14   : > { %v204_v20 = vadd.f32 %v290_v1, %v190_v11  ;;  %v205_v21 = vadd.f32 %v290_v1, %v191_v12  ;;  %v206_v22 = vadd.f32 %v290_v1, %v192_v13  ;;  %v194_v23 = vmul.f32 %v289_v0, %v178_v15 }
  0x15   : > { %v209_v24 = vmax.f32 %v201_v16, 0.0  ;;  %v210_v25 = vmax.f32 %v202_v17, 0.0  ;;  %v211_v26 = vmax.f32 %v203_v18, 0.0  ;;  %v207_v27 = vadd.f32 %v290_v1, %v193_v19 }
  0x16   : > { %v212_v28 = vmax.f32 %v204_v20, 0.0  ;;  %v213_v29 = vmax.f32 %v205_v21, 0.0  ;;  %v214_v30 = vmax.f32 %v206_v22, 0.0  ;;  %v208_v31 = vadd.f32 %v290_v1, %v194_v23 }
  0x17   : > { %217 = vst [vmem:[%s170_s24] sm:$0xff] %v209_v24  ;;  %218 = vst [vmem:[%s170_s24 + $0x8] sm:$0xff] %v210_v25  ;;  %v215_v32 = vmax.f32 %v207_v27, 0.0 }
  0x18   : > { %219 = vst [vmem:[%s170_s24 + $0x10] sm:$0xff] %v211_v26  ;;  %220 = vst [vmem:[%s170_s24 + $0x18] sm:$0xff] %v212_v28  ;;  %v216_v33 = vmax.f32 %v208_v31, 0.0 }
  0x19   : > { %221 = vst [vmem:[%s170_s24 + $0x20] sm:$0xff] %v213_v29  ;;  %222 = vst [vmem:[%s170_s24 + $0x28] sm:$0xff] %v214_v30 }
  0x1a   : > { %223 = vst [vmem:[%s170_s24 + $0x30] sm:$0xff] %v215_v32  ;;  %224 = vst [vmem:[%s170_s24 + $0x38] sm:$0xff] %v216_v33 }
  0x1b PF: > { %s13_s12 = sadd.s32 1, %s309_s12  }
  0x1c   : > { %p10_p4 = scmp.ge.s32.totalorder %s13_s12, 4  }
  0x1e   :  { %12 = sbr.rel (!%p10_p4) target bundleno = 1 (0x1), region = 62 }

// kernel: downsampl_forward.3
= control target key start
LH: loop header
LB: loop body
LE: loop exit
PB: predicated region body
PF: predicated region fallthrough
CT: control target
= control target key end

     0   :  { %s1085_s12 = smov 0   ;;  %s1353_s0 = inlined_call_operand.vmem [shape: f32[2,8,2,8,8], index: 0, kind: input, shape index: {}]   ;;  %s1354_s1 = inlined_call_operand.vmem [shape: f32[36,128], index: 1, kind: input, shape index: {}]   ;;  %s1355_s2 = inlined_call_operand.vmem [shape: f32[2,8,8,128], index: 2, kind: output, shape index: {0}]   ;;  %s1356_s3 = inlined_call_operand.vmem [shape: f32[2,2,128], index: 3, kind: output, shape index: {1}]  }
   0x1 LB: > { %s949_s13 = sadd.s32 4294967295, %s1053_s12   ;;  %p953_p0 = scmp.ge.s32.totalorder %s1053_s12, 1  ;;  %s1053_s12 = sphi %s1085_s12, %s14_s12  }
   0x2   : > { %p140_p1 = scmp.lt.s32.totalorder %s1053_s12, 3 }
   0x4   : > { %p141_p2 = pnand %p953_p0, %p140_p1 }
   0x5   : > { %p1095_p3 = scmp.lt.s32.totalorder (!%p141_p2), %s949_s13, 1  ;;  %vm247_vm0 = vcmask (!%p141_p2), 31744   ;;  %vm249_vm1 = vcmask (!%p141_p2), 25600   ;;  %vm255_vm2 = vcmask (!%p141_p2), 24576   ;;  %v1055_v0 = vmov (!%p141_p2), 0.0   ;;  %s1056_s19 = smov (!%p141_p2), 124  }
   0x6   : > { %144 = sbr.rel (%p141_p2) target bundleno = 613 (0x265), region = 28  ;;  %248 = vst.msk [vmem:[#allocation2] sm:$0xff] (!%p141_p2), %vm247_vm0, %v1055_v0  ;;  %252 = vst.msk [vmem:[#allocation2 + $0x90] sm:$0xff] (!%p141_p2), %vm247_vm0, %v1055_v0  ;;  %s1057_s20 = smov (!%p141_p2), 4   ;;  %v680_v53 = vld [vmem:[%s1354_s1] sm:$0xff] (!%p141_p2)  ;;  %v681_v54 = vld [vmem:[%s1354_s1 + $0x8] sm:$0xff] (!%p141_p2) }
   0x7   : > { %250 = vst.msk [vmem:[#allocation2 + $0x8] sm:$0x3] (!%p141_p2), %vm249_vm1, %v1055_v0  ;;  %253 = vst.msk [vmem:[#allocation2 + $0x98] sm:$0x3] (!%p141_p2), %vm249_vm1, %v1055_v0  ;;  %s1058_s21 = smov (!%p141_p2), 24   ;;  %s1059_s22 = smov (!%p141_p2), 8   ;;  %v1015_v55 = vpack.c.bf16 (!%p141_p2), %v681_v54, %v680_v53 }
   0x8   : > { %256 = vst.msk [vmem:[#allocation2 + $0x10] sm:$0x1] (!%p141_p2), %vm255_vm2, %v1055_v0  ;;  %257 = vst.msk [vmem:[#allocation2 + $0x20] sm:$0x1] (!%p141_p2), %vm255_vm2, %v1055_v0  ;;  %s1060_s23 = smov (!%p141_p2), 12   ;;  %s1061_s24 = smov (!%p141_p2), 16  }
   0x9   : > { %258 = vst.msk [vmem:[#allocation2 + $0x30] sm:$0x1] (!%p141_p2), %vm255_vm2, %v1055_v0  ;;  %259 = vst.msk [vmem:[#allocation2 + $0x40] sm:$0x1] (!%p141_p2), %vm255_vm2, %v1055_v0  ;;  %s1062_s25 = smov (!%p141_p2), 20   ;;  %1016 = vmatprep.subr.bf16.mxu0 (!%p141_p2), %v1015_v55  ;;  %1023 = vmatprep.subr.bf16.mxu1 (!%p141_p2), %v1015_v55  ;;  %v682_v57 = vld [vmem:[%s1354_s1 + $0x10] sm:$0xff] (!%p141_p2) }
   0xa   : > { %260 = vst.msk [vmem:[#allocation2 + $0x50] sm:$0x1] (!%p141_p2), %vm255_vm2, %v1055_v0  ;;  %261 = vst.msk [vmem:[#allocation2 + $0x60] sm:$0x1] (!%p141_p2), %vm255_vm2, %v1055_v0  ;;  %1018 = vmatpush3.bf16.msra.mxu0 (!%p141_p2), %v1015_v55  ;;  %v683_v58 = vld [vmem:[%s1354_s1 + $0x18] sm:$0xff] (!%p141_p2)  ;;  %1026 = vmatpush3.bf16.msra.mxu1 (!%p141_p2), %v1015_v55  ;;  %vm710_vm3 = vcmask (!%p141_p2), 1043456  }
   0xb   : > { %262 = vst.msk [vmem:[#allocation2 + $0x70] sm:$0x1] (!%p141_p2), %vm255_vm2, %v1055_v0  ;;  %263 = vst.msk [vmem:[#allocation2 + $0x80] sm:$0x1] (!%p141_p2), %vm255_vm2, %v1055_v0  ;;  %v1019_v59 = vpack.c.bf16 (!%p141_p2), %v683_v58, %v682_v57  ;;  %v684_v60 = vld [vmem:[%s1354_s1 + $0x20] sm:$0xf] (!%p141_p2) }
   0xc   : > { %264 = vst.msk [vmem:[#allocation2 + $0x19] sm:$0x1] (!%p141_p2), %vm255_vm2, %v1055_v0  ;;  %265 = vst.msk [vmem:[#allocation2 + $0x29] sm:$0x1] (!%p141_p2), %vm255_vm2, %v1055_v0  ;;  %s1063_s9 = smov (!%p141_p2), 28   ;;  %s1064_s10 = smov (!%p141_p2), 32  }
   0xd   : > { %266 = vst.msk [vmem:[#allocation2 + $0x39] sm:$0x1] %vm255_vm2, %v1055_v0  ;;  %267 = vst.msk [vmem:[#allocation2 + $0x49] sm:$0x1] %vm255_vm2, %v1055_v0  ;;  %s1359_s13 = smov (!%p1095_p3, %s949_s13), 1  ;;  %v336_v26 = vld [vmem:[#allocation2 + $0x90] sm:$0xff]  ;;  %1020 = vmatprep.subr.bf16.mxu0 %v1019_v59  ;;  %1024 = vmatprep.subr.bf16.mxu1 %v1019_v59 }
   0xe   : > { %268 = vst.msk [vmem:[#allocation2 + $0x59] sm:$0x1] %vm255_vm2, %v1055_v0  ;;  %269 = vst.msk [vmem:[#allocation2 + $0x69] sm:$0x1] %vm255_vm2, %v1055_v0  ;;  %s978_s15 = sshll.u32 %s1359_s13, 7  ;;  %v288_v25 = vld [vmem:[#allocation2 + $0x1] sm:$0xff]  ;;  %1022 = vmatpush3.bf16.msra.mxu0 %v1019_v59  ;;  %1027 = vmatpush3.bf16.msra.mxu1 %v1019_v59 }
   0xf   : > { %270 = vst.msk [vmem:[#allocation2 + $0x79] sm:$0x1] %vm255_vm2, %v1055_v0  ;;  %271 = vst.msk [vmem:[#allocation2 + $0x89] sm:$0x1] %vm255_vm2, %v1055_v0  ;;  %s172_s18 = scalar_lea.vmem %s1353_s0, %s978_s15  ;;  %v296_v27 = vld [vmem:[#allocation2 + $0x2] sm:$0xff]  ;;  %1001 = vmatprep.subr.msk.mxu0 %vm710_vm3, %v684_v60  ;;  %1025 = vmatprep.subr.msk.mxu1 %vm710_vm3, %v684_v60  ;;  %vm617_vm4 = vcmask 64512  }
  0x10   : > { %v182_v1 = vld [vmem:[%s172_s18] sm:$0xff]  ;;  %v959_v2 = vld [vmem:[%s172_s18 + $0x8] sm:$0xff]  ;;  %v183_v3 = vld [vmem:[%s172_s18 + $0x10] sm:$0xff]  ;;  %vm626_vm5 = vcmask 97280   ;;  %vm635_vm6 = vcmask 130048   ;;  %vm644_vm7 = vcmask 162816  }
  0x11   : > { %v199_v4 = vmax.f32 %v182_v1, %v959_v2  ;;  %v960_v5 = vld [vmem:[%s172_s18 + $0x18] sm:$0xff]  ;;  %v184_v6 = vld [vmem:[%s172_s18 + $0x20] sm:$0xff]  ;;  %v961_v7 = vld [vmem:[%s172_s18 + $0x28] sm:$0xff]  ;;  %vm653_vm8 = vcmask 195584   ;;  %vm662_vm9 = vcmask 228352   ;;  %vm671_vm10 = vcmask 261120  }
  0x12   : > { %v201_v8 = vmax.f32 %v184_v6, %v961_v7  ;;  %v185_v9 = vld [vmem:[%s172_s18 + $0x30] sm:$0xff]  ;;  %v962_v10 = vld [vmem:[%s172_s18 + $0x38] sm:$0xff]  ;;  %v200_v11 = vmax.f32 %v183_v3, %v960_v5  ;;  %v186_v13 = vld [vmem:[%s172_s18 + $0x40] sm:$0xff]  ;;  %1002 = vmatpush3.msk.msra.mxu0 %vm710_vm3, %v684_v60  ;;  %1028 = vmatpush3.msk.msra.mxu1 %vm710_vm3, %v684_v60  ;;  %vm685_vm11 = vcmask 293888   ;;  %s979_s11 = sshll.u32 %s1359_s13, 6  ;;  %s958_s17 = sshll.u32 %s1359_s13, 1 }
  0x13   : > { %215 = vrot.lane.b32.xlu0 %v199_v4, %s1056_s19  ;;  %v202_v12 = vmax.f32 %v185_v9, %v962_v10  ;;  %v963_v14 = vld [vmem:[%s172_s18 + $0x48] sm:$0xff]  ;;  %v187_v15 = vld [vmem:[%s172_s18 + $0x50] sm:$0xff]  ;;  %v964_v16 = vld [vmem:[%s172_s18 + $0x58] sm:$0xff]  ;;  %s1336_s16 = scalar_lea.vmem %s1355_s2, %s979_s11 }
  0x14   : > { %219 = vrot.lane.b32.xlu1 %v201_v8, %s1056_s19  ;;  %v203_v17 = vmax.f32 %v186_v13, %v963_v14  ;;  %v204_v18 = vmax.f32 %v187_v15, %v964_v16  ;;  %v188_v19 = vld [vmem:[%s172_s18 + $0x60] sm:$0xff]  ;;  %v965_v20 = vld [vmem:[%s172_s18 + $0x68] sm:$0xff]  ;;  %v189_v21 = vld [vmem:[%s172_s18 + $0x70] sm:$0xff] }
  0x15   : > { %v966_v22 = vld [vmem:[%s172_s18 + $0x78] sm:$0xff]  ;;  %v205_v23 = vmax.f32 %v188_v19, %v965_v20 }
  0x16   : > { %v206_v24 = vmax.f32 %v189_v21, %v966_v22  ;;  %v344_v14 = vld [vmem:[#allocation2 + $0x91] sm:$0xff] }
  0x17   : > { %217 = vrot.lane.b32.xlu0 %v200_v11, %s1056_s19 }
  0x18   : > { %221 = vrot.lane.b32.xlu1 %v202_v12, %s1056_s19 }
  0x1b   : > { %223 = vrot.lane.b32.xlu0 %v203_v17, %s1056_s19 }
  0x1c   : > { %225 = vrot.lane.b32.xlu1 %v204_v18, %s1056_s19 }
  0x1f   : > { %227 = vrot.lane.b32.xlu0 %v205_v23, %s1056_s19 }
  0x20   : > { %229 = vrot.lane.b32.xlu1 %v206_v24, %s1056_s19 }
  0x23   : > { %361 = vrot.lane.b32.xlu0 %v288_v25, %s1057_s20 }
  0x24   : > { %535 = vrot.lane.b32.xlu1 %v336_v26, %s1058_s21 }
  0x27   : > { %393 = vrot.lane.b32.xlu0 %v296_v27, %s1059_s22 }
  0x85   : > { %v216_v28 = vpop.permute.xlu0 %215 }
  0x86   : > { %v239_v29 = vmax.f32 %v199_v4, %v216_v28  ;;  %v220_v30 = vpop.permute.xlu1 %219 }
  0x87   : > { %v241_v31 = vmax.f32 %v201_v8, %v220_v30 }
  0x88   : > { %272 = vst.msk [vmem:[#allocation2 + $0x11] sm:$0xff] %vm247_vm0, %v239_v29 }
  0x89   : > { %v218_v32 = vpop.permute.xlu0 %217  ;;  %274 = vst.msk [vmem:[#allocation2 + $0x31] sm:$0xff] %vm247_vm0, %v241_v31 }
  0x8a   : > { %v240_v33 = vmax.f32 %v200_v11, %v218_v32  ;;  %v222_v34 = vpop.permute.xlu1 %221  ;;  %v280_v32 = vld [vmem:[#allocation2] sm:$0xff] }
  0x8b   : > { %v242_v35 = vmax.f32 %v202_v12, %v222_v34 }
  0x8c   : > { %273 = vst.msk [vmem:[#allocation2 + $0x21] sm:$0xff] %vm247_vm0, %v240_v33 }
  0x8d   : > { %275 = vst.msk [vmem:[#allocation2 + $0x41] sm:$0xff] %vm247_vm0, %v242_v35  ;;  %v224_v36 = vpop.permute.xlu0 %223 }
  0x8e   : > { %v243_v37 = vmax.f32 %v203_v17, %v224_v36  ;;  %v226_v38 = vpop.permute.xlu1 %225  ;;  %v352_v17 = vld [vmem:[#allocation2 + $0x92] sm:$0xff] }
  0x8f   : > { %v1134_v39 = vld [vmem:[#allocation2 + $0x10] sm:$0xff]  ;;  %v244_v41 = vmax.f32 %v204_v18, %v226_v38 }
  0x90   : > { %v289_v40 = vld [vmem:[#allocation2 + $0x11] sm:$0xff]  ;;  %425 = vrot.lane.b32.xlu0 %v1134_v39, %s1060_s23  ;;  %276 = vst.msk [vmem:[#allocation2 + $0x51] sm:$0xff] %vm247_vm0, %v243_v37 }
  0x91   : > { %363 = vrot.lane.b32.xlu1 %v289_v40, %s1057_s20  ;;  %277 = vst.msk [vmem:[#allocation2 + $0x61] sm:$0xff] %vm247_vm0, %v244_v41  ;;  %v228_v42 = vpop.permute.xlu0 %227  ;;  %v297_v45 = vld [vmem:[#allocation2 + $0x12] sm:$0xff] }
  0x92   : > { %v245_v43 = vmax.f32 %v205_v23, %v228_v42  ;;  %v230_v44 = vpop.permute.xlu1 %229  ;;  %v291_v49 = vld [vmem:[#allocation2 + $0x31] sm:$0xff] }
  0x93   : > { %v246_v46 = vmax.f32 %v206_v24, %v230_v44  ;;  %v313_v47 = vld [vmem:[#allocation2 + $0x21] sm:$0xff]  ;;  %v299_v51 = vld [vmem:[#allocation2 + $0x32] sm:$0xff] }
  0x94   : > { %457 = vrot.lane.b32.xlu0 %v289_v40, %s1061_s24  ;;  %278 = vst.msk [vmem:[#allocation2 + $0x71] sm:$0xff] %vm247_vm0, %v245_v43  ;;  %v1144_v48 = vld [vmem:[#allocation2 + $0x20] sm:$0xff]  ;;  %v1156_v52 = vld [vmem:[#allocation2 + $0x30] sm:$0xff] }
  0x95   : > { %395 = vrot.lane.b32.xlu1 %v297_v45, %s1059_s22  ;;  %279 = vst.msk [vmem:[#allocation2 + $0x81] sm:$0xff] %vm247_vm0, %v246_v46  ;;  %v321_v50 = vld [vmem:[#allocation2 + $0x22] sm:$0xff]  ;;  %v362_v10 = vpop.permute.xlu0 %361 }
  0x96   : > { %v1168_v56 = vld [vmem:[#allocation2 + $0x40] sm:$0xff]  ;;  %v1236_v11 = vpop.permute.xlu1 %535  ;;  %v609_v33 = vsel %vm247_vm0, %v280_v32, %v362_v10 }
  0x97   : > { %v292_v61 = vld [vmem:[#allocation2 + $0x41] sm:$0xff]  ;;  %v293_v62 = vld [vmem:[#allocation2 + $0x51] sm:$0xff] }
  0x98   : > { %459 = vrot.lane.b32.xlu0 %v313_v47, %s1061_s24  ;;  %v323_v63 = vld [vmem:[#allocation2 + $0x42] sm:$0xff]  ;;  %v301_v0 = vld [vmem:[#allocation2 + $0x52] sm:$0xff] }
  0x99   : > { %427 = vrot.lane.b32.xlu1 %v1144_v48, %s1060_s23  ;;  %v1195_v1 = vld [vmem:[#allocation2 + $0x50] sm:$0xff]  ;;  %v1201_v2 = vld [vmem:[#allocation2 + $0x60] sm:$0xff]  ;;  %v394_v12 = vpop.permute.xlu0 %393 }
  0x9a   : > { %v294_v3 = vld [vmem:[#allocation2 + $0x61] sm:$0xff]  ;;  %v618_v36 = vsel %vm617_vm4, %v609_v33, %v394_v12 }
  0x9b   : > { %v295_v4 = vld [vmem:[#allocation2 + $0x71] sm:$0xff]  ;;  %v325_v5 = vld [vmem:[#allocation2 + $0x62] sm:$0xff] }
  0x9c   : > { %367 = vrot.lane.b32.xlu0 %v291_v49, %s1057_s20  ;;  %v303_v6 = vld [vmem:[#allocation2 + $0x72] sm:$0xff]  ;;  %v311_v8 = vld [vmem:[#allocation2 + $0x80] sm:$0xff] }
  0x9d   : > { %365 = vrot.lane.b32.xlu1 %v313_v47, %s1057_s20  ;;  %v1219_v7 = vld [vmem:[#allocation2 + $0x70] sm:$0xff]  ;;  %v319_v9 = vld [vmem:[#allocation2 + $0x81] sm:$0xff] }
  0x9e   : > { %v327_v13 = vld [vmem:[#allocation2 + $0x82] sm:$0xff] }
  0xa0   : > { %491 = vrot.lane.b32.xlu0 %v321_v50, %s1062_s25 }
  0xa1   : > { %489 = vrot.lane.b32.xlu1 %v297_v45, %s1062_s25 }
  0xa4   : > { %399 = vrot.lane.b32.xlu0 %v299_v51, %s1059_s22 }
  0xa5   : > { %397 = vrot.lane.b32.xlu1 %v321_v50, %s1059_s22 }
  0xa8   : > { %523 = vrot.lane.b32.xlu0 %v1156_v52, %s1058_s21 }
  0xa9   : > { %521 = vrot.lane.b32.xlu1 %v1144_v48, %s1058_s21 }
  0xac   : > { %431 = vrot.lane.b32.xlu0 %v1168_v56, %s1060_s23 }
  0xad   : > { %429 = vrot.lane.b32.xlu1 %v1156_v52, %s1060_s23 }
  0xb0   : > { %555 = vrot.lane.b32.xlu0 %v291_v49, %s1063_s9 }
  0xb1   : > { %553 = vrot.lane.b32.xlu1 %v313_v47, %s1063_s9 }
  0xb4   : > { %369 = vrot.lane.b32.xlu0 %v292_v61, %s1057_s20 }
  0xb5   : > { %461 = vrot.lane.b32.xlu1 %v291_v49, %s1061_s24 }
  0xb8   : > { %493 = vrot.lane.b32.xlu0 %v299_v51, %s1062_s25 }
  0xb9   : > { %585 = vrot.lane.b32.xlu1 %v321_v50, %s1064_s10 }
  0xbc   : > { %371 = vrot.lane.b32.xlu0 %v293_v62, %s1057_s20 }
  0xbd   : > { %463 = vrot.lane.b32.xlu1 %v292_v61, %s1061_s24 }
  0xc0   : > { %495 = vrot.lane.b32.xlu0 %v323_v63, %s1062_s25 }
  0xc1   : > { %587 = vrot.lane.b32.xlu1 %v299_v51, %s1064_s10 }
  0xc4   : > { %403 = vrot.lane.b32.xlu0 %v301_v0, %s1059_s22 }
  0xc5   : > { %401 = vrot.lane.b32.xlu1 %v323_v63, %s1059_s22 }
  0xc8   : > { %527 = vrot.lane.b32.xlu0 %v1195_v1, %s1058_s21 }
  0xc9   : > { %525 = vrot.lane.b32.xlu1 %v1168_v56, %s1058_s21 }
  0xcc   : > { %435 = vrot.lane.b32.xlu0 %v1201_v2, %s1060_s23 }
  0xcd   : > { %433 = vrot.lane.b32.xlu1 %v1195_v1, %s1060_s23 }
  0xd0   : > { %559 = vrot.lane.b32.xlu0 %v293_v62, %s1063_s9 }
  0xd1   : > { %557 = vrot.lane.b32.xlu1 %v292_v61, %s1063_s9 }
  0xd4   : > { %373 = vrot.lane.b32.xlu0 %v294_v3, %s1057_s20 }
  0xd5   : > { %465 = vrot.lane.b32.xlu1 %v293_v62, %s1061_s24 }
  0xd8   : > { %497 = vrot.lane.b32.xlu0 %v301_v0, %s1062_s25 }
  0xd9   : > { %589 = vrot.lane.b32.xlu1 %v323_v63, %s1064_s10 }
  0xdc   : > { %375 = vrot.lane.b32.xlu0 %v295_v4, %s1057_s20  ;;  %s181_s20 = scalar_lea.vmem %s1356_s3, %s958_s17 }
  0xdd   : > { %467 = vrot.lane.b32.xlu1 %v294_v3, %s1061_s24 }
  0xe0   : > { %499 = vrot.lane.b32.xlu0 %v325_v5, %s1062_s25 }
  0xe1   : > { %591 = vrot.lane.b32.xlu1 %v301_v0, %s1064_s10 }
  0xe4   : > { %407 = vrot.lane.b32.xlu0 %v303_v6, %s1059_s22 }
  0xe5   : > { %405 = vrot.lane.b32.xlu1 %v325_v5, %s1059_s22 }
  0xe8   : > { %531 = vrot.lane.b32.xlu0 %v1219_v7, %s1058_s21 }
  0xe9   : > { %529 = vrot.lane.b32.xlu1 %v1201_v2, %s1058_s21 }
  0xec   : > { %439 = vrot.lane.b32.xlu0 %v311_v8, %s1060_s23 }
  0xed   : > { %437 = vrot.lane.b32.xlu1 %v1219_v7, %s1060_s23 }
  0xf0   : > { %563 = vrot.lane.b32.xlu0 %v295_v4, %s1063_s9 }
  0xf1   : > { %561 = vrot.lane.b32.xlu1 %v294_v3, %s1063_s9 }
  0xf4   : > { %471 = vrot.lane.b32.xlu0 %v319_v9, %s1061_s24 }
  0xf5   : > { %469 = vrot.lane.b32.xlu1 %v295_v4, %s1061_s24 }
  0xf8   : > { %595 = vrot.lane.b32.xlu0 %v303_v6, %s1064_s10 }
  0xf9   : > { %593 = vrot.lane.b32.xlu1 %v325_v5, %s1064_s10 }
  0xfc   : > { %533 = vrot.lane.b32.xlu0 %v311_v8, %s1058_s21 }
  0xfd   : > { %501 = vrot.lane.b32.xlu1 %v303_v6, %s1062_s25 }
 0x100   : > { %565 = vrot.lane.b32.xlu0 %v319_v9, %s1063_s9 }
 0x101   : > { %503 = vrot.lane.b32.xlu1 %v327_v13, %s1062_s25 }
 0x102   : > { %v426_v16 = vpop.permute.xlu0 %425 }
 0x103   : > { %v364_v15 = vpop.permute.xlu1 %363  ;;  %v627_v37 = vsel %vm626_vm5, %v618_v36, %v426_v16 }
 0x104   : > { %597 = vrot.lane.b32.xlu0 %v327_v13, %s1064_s10  ;;  %v610_v44 = vsel %vm247_vm0, %v1134_v39, %v364_v15 }
 0x105   : > { %567 = vrot.lane.b32.xlu1 %v344_v14, %s1063_s9 }
 0x106   : > { %v458_v19 = vpop.permute.xlu0 %457 }
 0x107   : > { %v396_v18 = vpop.permute.xlu1 %395  ;;  %v636_v41 = vsel %vm635_vm6, %v627_v37, %v458_v19 }
 0x108   : > { %v619_v49 = vsel %vm617_vm4, %v610_v44, %v396_v18 }
 0x109   : > { %599 = vrot.lane.b32.xlu1 %v352_v17, %s1064_s10 }
 0x10a   : > { %v460_v21 = vpop.permute.xlu0 %459 }
 0x10b   : > { %v428_v20 = vpop.permute.xlu1 %427 }
 0x10c   : > { %v628_v51 = vsel %vm626_vm5, %v619_v49, %v428_v20 }
 0x10d   : > { %v637_v55 = vsel %vm635_vm6, %v628_v51, %v460_v21 }
 0x10e   : > { %v1243_v23 = vpop.permute.xlu0 %367 }
 0x10f   : > { %v366_v22 = vpop.permute.xlu1 %365 }
 0x110   : > { %v611_v9 = vsel %vm247_vm0, %v1144_v48, %v366_v22  ;;  %v612_v48 = vsel %vm247_vm0, %v1156_v52, %v1243_v23 }
 0x112   : > { %v492_v25 = vpop.permute.xlu0 %491 }
 0x113   : > { %v490_v24 = vpop.permute.xlu1 %489  ;;  %v646_v57 = vsel %vm644_vm7, %v637_v55, %v492_v25 }
 0x114   : > { %v645_v42 = vsel %vm644_vm7, %v636_v41, %v490_v24 }
 0x116   : > { %v1245_v27 = vpop.permute.xlu0 %399 }
 0x117   : > { %v398_v26 = vpop.permute.xlu1 %397  ;;  %v621_v22 = vsel %vm617_vm4, %v612_v48, %v1245_v27 }
 0x118   : > { %v620_v10 = vsel %vm617_vm4, %v611_v9, %v398_v26 }
 0x11a   : > { %v524_v29 = vpop.permute.xlu0 %523 }
 0x11b   : > { %v522_v28 = vpop.permute.xlu1 %521  ;;  %v655_v39 = vsel %vm653_vm8, %v646_v57, %v524_v29 }
 0x11c   : > { %v654_v43 = vsel %vm653_vm8, %v645_v42, %v522_v28 }
 0x11e   : > { %v432_v31 = vpop.permute.xlu0 %431 }
 0x11f   : > { %v430_v30 = vpop.permute.xlu1 %429  ;;  %v630_v24 = vsel %vm626_vm5, %v621_v22, %v432_v31 }
 0x120   : > { %v629_v12 = vsel %vm626_vm5, %v620_v10, %v430_v30 }
 0x122   : > { %v556_v35 = vpop.permute.xlu0 %555 }
 0x123   : > { %v554_v34 = vpop.permute.xlu1 %553  ;;  %v664_v58 = vsel %vm662_vm9, %v655_v39, %v556_v35 }
 0x124   : > { %v663_v45 = vsel %vm662_vm9, %v654_v43, %v554_v34 }
 0x126   : > { %v1250_v40 = vpop.permute.xlu0 %369 }
 0x127   : > { %v462_v38 = vpop.permute.xlu1 %461  ;;  %v613_v42 = vsel %vm247_vm0, %v1168_v56, %v1250_v40 }
 0x128   : > { %v638_v15 = vsel %vm635_vm6, %v629_v12, %v462_v38 }
 0x12a   : > { %v494_v47 = vpop.permute.xlu0 %493 }
 0x12b   : > { %v586_v46 = vpop.permute.xlu1 %585  ;;  %v647_v16 = vsel %vm644_vm7, %v638_v15, %v494_v47 }
 0x12c   : > { %v672_v50 = vsel %vm671_vm10, %v663_v45, %v586_v46 }
 0x12d   : > { %1003 = vmatprep.mubr.msk.f32.mxu0 %vm685_vm11, %v672_v50 }
 0x12e   : > { %v372_v54 = vpop.permute.xlu0 %371 }
 0x12f   : > { %v464_v53 = vpop.permute.xlu1 %463  ;;  %v614_v43 = vsel %vm247_vm0, %v1195_v1, %v372_v54 }
 0x130   : > { %v639_v28 = vsel %vm635_vm6, %v630_v24, %v464_v53 }
 0x132   : > { %v496_v60 = vpop.permute.xlu0 %495 }
 0x133   : > { %v588_v59 = vpop.permute.xlu1 %587  ;;  %v648_v29 = vsel %vm644_vm7, %v639_v28, %v496_v60 }
 0x134   : > { %v673_v61 = vsel %vm671_vm10, %v664_v58, %v588_v59 }
 0x135   : > { %1004 = vmatmul.mubr.msk.f32.vlgmr.msra.gmra.mrb[0].mxu0 %vm685_vm11, %v673_v61 }
 0x136   : > { %v404_v63 = vpop.permute.xlu0 %403 }
 0x137   : > { %v402_v62 = vpop.permute.xlu1 %401  ;;  %v623_v45 = vsel %vm617_vm4, %v614_v43, %v404_v63 }
 0x138   : > { %v622_v44 = vsel %vm617_vm4, %v613_v42, %v402_v62 }
 0x13a   : > { %v528_v3 = vpop.permute.xlu0 %527 }
 0x13b   : > { %v526_v0 = vpop.permute.xlu1 %525  ;;  %v657_v30 = vsel %vm653_vm8, %v648_v29, %v528_v3 }
 0x13c   : > { %v656_v17 = vsel %vm653_vm8, %v647_v16, %v526_v0 }
 0x13e   : > { %v436_v5 = vpop.permute.xlu0 %435 }
 0x13f   : > { %v434_v4 = vpop.permute.xlu1 %433  ;;  %v632_v47 = vsel %vm626_vm5, %v623_v45, %v436_v5 }
 0x140   : > { %v631_v46 = vsel %vm626_vm5, %v622_v44, %v434_v4 }
 0x142   : > { %v560_v8 = vpop.permute.xlu0 %559 }
 0x143   : > { %v558_v6 = vpop.permute.xlu1 %557  ;;  %v666_v32 = vsel %vm662_vm9, %v657_v30, %v560_v8 }
 0x144   : > { %v665_v18 = vsel %vm662_vm9, %v656_v17, %v558_v6 }
 0x146   : > { %v374_v14 = vpop.permute.xlu0 %373 }
 0x147   : > { %v466_v13 = vpop.permute.xlu1 %465  ;;  %v615_v61 = vsel %vm247_vm0, %v1201_v2, %v374_v14 }
 0x148   : > { %v640_v51 = vsel %vm635_vm6, %v631_v46, %v466_v13 }
 0x14a   : > { %v498_v20 = vpop.permute.xlu0 %497 }
 0x14b   : > { %v590_v19 = vpop.permute.xlu1 %589  ;;  %v649_v55 = vsel %vm644_vm7, %v640_v51, %v498_v20 }
 0x14c   : > { %v674_v21 = vsel %vm671_vm10, %v665_v18, %v590_v19 }
 0x14d   : > { %1006 = vmatprep.mubr.msk.f32.mxu0 %vm685_vm11, %v674_v21 }
 0x14e   : > { %v376_v26 = vpop.permute.xlu0 %375 }
 0x14f   : > { %v468_v25 = vpop.permute.xlu1 %467  ;;  %v616_v5 = vsel %vm247_vm0, %v1219_v7, %v376_v26 }
 0x150   : > { %v641_v53 = vsel %vm635_vm6, %v632_v47, %v468_v25 }
 0x152   : > { %v500_v34 = vpop.permute.xlu0 %499 }
 0x153   : > { %v592_v33 = vpop.permute.xlu1 %591  ;;  %v650_v56 = vsel %vm644_vm7, %v641_v53, %v500_v34 }
 0x154   : > { %v675_v52 = vsel %vm671_vm10, %v666_v32, %v592_v33 }
 0x155   : > { %1007 = vmatmul.mubr.msk.f32.gmra.mrb[2].mxu0 %vm685_vm11, %v675_v52 }
 0x156   : > { %v408_v27 = vpop.permute.xlu0 %407 }
 0x157   : > { %v406_v23 = vpop.permute.xlu1 %405  ;;  %v625_v10 = vsel %vm617_vm4, %v616_v5, %v408_v27 }
 0x158   : > { %v624_v0 = vsel %vm617_vm4, %v615_v61, %v406_v23 }
 0x15a   : > { %v532_v31 = vpop.permute.xlu0 %531 }
 0x15b   : > { %v530_v35 = vpop.permute.xlu1 %529  ;;  %v659_v40 = vsel %vm653_vm8, %v650_v56, %v532_v31 }
 0x15c   : > { %v658_v1 = vsel %vm653_vm8, %v649_v55, %v530_v35 }
 0x15e   : > { %v440_v37 = vpop.permute.xlu0 %439 }
 0x15f   : > { %v438_v36 = vpop.permute.xlu1 %437  ;;  %v634_v2 = vsel %vm626_vm5, %v625_v10, %v440_v37 }
 0x160   : > { %v633_v3 = vsel %vm626_vm5, %v624_v0, %v438_v36 }
 0x162   : > { %v564_v41 = vpop.permute.xlu0 %563 }
 0x163   : > { %v562_v38 = vpop.permute.xlu1 %561  ;;  %v668_v57 = vsel %vm662_vm9, %v659_v40, %v564_v41 }
 0x164   : > { %v667_v54 = vsel %vm662_vm9, %v658_v1, %v562_v38 }
 0x166   : > { %v472_v50 = vpop.permute.xlu0 %471 }
 0x167   : > { %v470_v49 = vpop.permute.xlu1 %469  ;;  %v643_v12 = vsel %vm635_vm6, %v634_v2, %v472_v50 }
 0x168   : > { %v642_v4 = vsel %vm635_vm6, %v633_v3, %v470_v49 }
 0x16a   : > { %v596_v58 = vpop.permute.xlu0 %595 }
 0x16b   : > { %v594_v39 = vpop.permute.xlu1 %593  ;;  %v677_v59 = vsel %vm671_vm10, %v668_v57, %v596_v58 }
 0x16c   : > { %v676_v60 = vsel %vm671_vm10, %v667_v54, %v594_v39 }
 0x16d   : > { %1009 = vmatprep.mubr.msk.f32.mxu1 %vm685_vm11, %v676_v60 }
 0x16e   : > { %1010 = vmatmul.mubr.msk.f32.vlgmr.msra.gmra.mrb[0].mxu1 %vm685_vm11, %v677_v59  ;;  %v534_v63 = vpop.permute.xlu0 %533 }
 0x16f   : > { %v502_v62 = vpop.permute.xlu1 %501 }
 0x170   : > { %v651_v6 = vsel %vm644_vm7, %v642_v4, %v502_v62 }
 0x171   : > { %v660_v13 = vsel %vm653_vm8, %v651_v6, %v534_v63 }
 0x172   : > { %v566_v9 = vpop.permute.xlu0 %565 }
 0x173   : > { %v504_v8 = vpop.permute.xlu1 %503  ;;  %v669_v15 = vsel %vm662_vm9, %v660_v13, %v566_v9 }
 0x174   : > { %v652_v14 = vsel %vm644_vm7, %v643_v12, %v504_v8 }
 0x175   : > { %v661_v18 = vsel %vm653_vm8, %v652_v14, %v1236_v11 }
 0x176   : > { %v598_v17 = vpop.permute.xlu0 %597 }
 0x177   : > { %v568_v16 = vpop.permute.xlu1 %567  ;;  %v678_v7 = vsel %vm671_vm10, %v669_v15, %v598_v17 }
 0x178   : > { %1012 = vmatprep.mubr.msk.f32.mxu1 %vm685_vm11, %v678_v7  ;;  %v670_v19 = vsel %vm662_vm9, %v661_v18, %v568_v16 }
 0x17b   : > { %v600_v20 = vpop.permute.xlu1 %599 }
 0x17c   : > { %v679_v21 = vsel %vm671_vm10, %v670_v19, %v600_v20 }
 0x17d   : > { %1013 = vmatmul.mubr.msk.f32.gmra.mrb[2].mxu1 %vm685_vm11, %v679_v21 }
 0x208   : > { %v1005_v48 = vpop.f32.mrb[0].mxu0 }
 0x209   : > { %820 = vst [vmem:[%s1336_s16 + $0x8] sm:$0xff] %v1005_v48  ;;  %v842_v11 = vmul.f32 %v1005_v48, %v1005_v48  ;;  %v780_v22 = vpop.f32.mrb[1].mxu0 }
 0x20a   : > { %819 = vst [vmem:[%s1336_s16] sm:$0xff] %v780_v22  ;;  %v827_v24 = vadd.f32 %v1005_v48, %v780_v22  ;;  %v841_v25 = vmul.f32 %v780_v22, %v780_v22 }
 0x20c   : > { %v849_v26 = vadd.f32 %v842_v11, %v841_v25 }
 0x228   : > { %v1008_v28 = vpop.f32.mrb[2].mxu0 }
 0x229   : > { %822 = vst [vmem:[%s1336_s16 + $0x18] sm:$0xff] %v1008_v28  ;;  %v790_v29 = vpop.f32.mrb[3].mxu0  ;;  %v844_v33 = vmul.f32 %v1008_v28, %v1008_v28 }
 0x22a   : > { %821 = vst [vmem:[%s1336_s16 + $0x10] sm:$0xff] %v790_v29  ;;  %v828_v30 = vadd.f32 %v827_v24, %v790_v29  ;;  %v843_v32 = vmul.f32 %v790_v29, %v790_v29 }
 0x22c   : > { %v829_v34 = vadd.f32 %v1008_v28, %v828_v30  ;;  %v850_v52 = vadd.f32 %v849_v26, %v843_v32 }
 0x22e   : > { %v851_v23 = vadd.f32 %v850_v52, %v844_v33 }
 0x241   : > { %v1011_v27 = vpop.f32.mrb[0].mxu1 }
 0x242   : > { %824 = vst [vmem:[%s1336_s16 + $0x28] sm:$0xff] %v1011_v27  ;;  %v800_v35 = vpop.f32.mrb[1].mxu1  ;;  %v846_v37 = vmul.f32 %v1011_v27, %v1011_v27 }
 0x243   : > { %823 = vst [vmem:[%s1336_s16 + $0x20] sm:$0xff] %v800_v35  ;;  %v830_v31 = vadd.f32 %v829_v34, %v800_v35  ;;  %v845_v36 = vmul.f32 %v800_v35, %v800_v35 }
 0x245   : > { %v852_v38 = vadd.f32 %v851_v23, %v845_v36  ;;  %v831_v41 = vadd.f32 %v1011_v27, %v830_v31 }
 0x247   : > { %v853_v42 = vadd.f32 %v852_v38, %v846_v37 }
 0x250   : > { %v1014_v43 = vpop.f32.mrb[2].mxu1 }
 0x251   : > { %826 = vst [vmem:[%s1336_s16 + $0x38] sm:$0xff] %v1014_v43  ;;  %v810_v44 = vpop.f32.mrb[3].mxu1  ;;  %v848_v47 = vmul.f32 %v1014_v43, %v1014_v43 }
 0x252   : > { %825 = vst [vmem:[%s1336_s16 + $0x30] sm:$0xff] %v810_v44  ;;  %v832_v45 = vadd.f32 %v831_v41, %v810_v44  ;;  %v847_v46 = vmul.f32 %v810_v44, %v810_v44 }
 0x254   : > { %v833_v49 = vadd.f32 %v1014_v43, %v832_v45  ;;  %v854_v50 = vadd.f32 %v853_v42, %v847_v46 }
 0x256   : > { %v834_v51 = vrot.slane %v833_v49, 4  ;;  %v855_v53 = vadd.f32 %v854_v50, %v848_v47 }
 0x258   : > { %v835_v55 = vadd.f32 %v834_v51, %v833_v49  ;;  %v856_v56 = vrot.slane %v855_v53, 4 }
 0x25a   : > { %v836_v1 = vrot.slane %v835_v55, 2  ;;  %v857_v40 = vadd.f32 %v856_v56, %v855_v53 }
 0x25c   : > { %v837_v54 = vadd.f32 %v836_v1, %v835_v55  ;;  %v858_v57 = vrot.slane %v857_v40, 2 }
 0x25e   : > { %v838_v39 = vrot.slane %v837_v54, 1  ;;  %v859_v58 = vadd.f32 %v858_v57, %v857_v40 }
 0x260   : > { %v839_v59 = vadd.f32 %v838_v39, %v837_v54  ;;  %v860_v60 = vrot.slane %v859_v58, 1 }
 0x262   : > { %840 = vst [vmem:[%s181_s20] sm:$0x1] %v839_v59  ;;  %v861_v61 = vadd.f32 %v860_v60, %v859_v58 }
 0x264   : > { %862 = vst [vmem:[%s181_s20 + $0x1] sm:$0x1] %v861_v61 }
 0x265 PF: > { %s14_s12 = sadd.s32 1, %s1053_s12  }
 0x266   : > { %p11_p4 = scmp.ge.s32.totalorder %s14_s12, 4  }
 0x268   :  { %13 = sbr.rel (!%p11_p4) target bundleno = 1 (0x1), region = 74 }

// kernel: downsampl_forward.4
= control target key start
LH: loop header
LB: loop body
LE: loop exit
PB: predicated region body
PF: predicated region fallthrough
CT: control target
= control target key end

     0   :  { %s1716_s18 = smov 0   ;;  %s2368_s0 = inlined_call_operand.vmem [shape: f32[2,8,8,128], index: 0, kind: input, shape index: {}]   ;;  %s2369_s1 = inlined_call_operand.vmem [shape: f32[1,128], index: 1, kind: input, shape index: {}]   ;;  %s2370_s2 = inlined_call_operand.vmem [shape: f32[1,128], index: 2, kind: input, shape index: {}]   ;;  %s2371_s3 = inlined_call_operand.vmem [shape: f32[1152,128], index: 3, kind: input, shape index: {}]   ;;  %s2372_s4 = inlined_call_operand.vmem [shape: f32[2,8,8,128], index: 4, kind: output, shape index: {0}]   ;;  %s2373_s5 = inlined_call_operand.vmem [shape: f32[2,2,128], index: 5, kind: output, shape index: {1}]  }
   0x1 LB: > { %s1184_s19 = sadd.s32 4294967295, %s1683_s18   ;;  %p1188_p0 = scmp.ge.s32.totalorder %s1683_s18, 1  ;;  %s1683_s18 = sphi %s1716_s18, %s16_s18  }
   0x2   : > { %p190_p1 = scmp.lt.s32.totalorder %s1683_s18, 3 }
   0x4   : > { %p191_p2 = pnand %p1188_p0, %p190_p1 }
   0x5   : > { %v401_v0 = vld [vmem:[%s2371_s3 + $0x80] sm:$0xff] (!%p191_p2)  ;;  %v402_v1 = vld [vmem:[%s2371_s3 + $0x88] sm:$0xff] (!%p191_p2)  ;;  %v1685_v7 = vmov (!%p191_p2), 0.0   ;;  %v403_v12 = vld [vmem:[%s2371_s3 + $0x90] sm:$0xff] (!%p191_p2)  ;;  %p1818_p3 = scmp.lt.s32.totalorder (!%p191_p2), %s1184_s19, 1 }
   0x6   : > { %194 = sbr.rel (%p191_p2) target bundleno = 353 (0x161), region = 36  ;;  %v433_v2 = vld [vmem:[%s2371_s3 + $0x180] sm:$0xff] (!%p191_p2)  ;;  %v1492_v3 = vpack.c.bf16 (!%p191_p2), %v402_v1, %v401_v0  ;;  %v434_v4 = vld [vmem:[%s2371_s3 + $0x188] sm:$0xff] (!%p191_p2)  ;;  %282 = vst [vmem:[#allocation2] sm:$0xff] (!%p191_p2), %v1685_v7  ;;  %283 = vst [vmem:[#allocation2 + $0x8] sm:$0x3] (!%p191_p2), %v1685_v7 }
   0x7   : > { %v385_v5 = vld [vmem:[%s2371_s3] sm:$0xff] (!%p191_p2)  ;;  %v386_v6 = vld [vmem:[%s2371_s3 + $0x8] sm:$0xff] (!%p191_p2)  ;;  %285 = vst [vmem:[#allocation2 + $0x90] sm:$0xff] (!%p191_p2), %v1685_v7  ;;  %286 = vst [vmem:[#allocation2 + $0x98] sm:$0x3] (!%p191_p2), %v1685_v7  ;;  %v1524_v8 = vpack.c.bf16 (!%p191_p2), %v434_v4, %v433_v2 }
   0x8   : > { %288 = vst [vmem:[#allocation2 + $0x10] sm:$0x1] (!%p191_p2), %v1685_v7  ;;  %289 = vst [vmem:[#allocation2 + $0x20] sm:$0x1] (!%p191_p2), %v1685_v7  ;;  %v1494_v9 = vpack.c.bf16 (!%p191_p2), %v386_v6, %v385_v5  ;;  %v417_v10 = vld [vmem:[%s2371_s3 + $0x100] sm:$0xff] (!%p191_p2)  ;;  %v418_v11 = vld [vmem:[%s2371_s3 + $0x108] sm:$0xff] (!%p191_p2)  ;;  %1493 = vmatprep.subr.bf16.mxu0 (!%p191_p2), %v1492_v3 }
   0x9   : > { %290 = vst [vmem:[#allocation2 + $0x30] sm:$0x1] (!%p191_p2), %v1685_v7  ;;  %291 = vst [vmem:[#allocation2 + $0x40] sm:$0x1] (!%p191_p2), %v1685_v7  ;;  %v1526_v13 = vpack.c.bf16 (!%p191_p2), %v418_v11, %v417_v10  ;;  %v404_v14 = vld [vmem:[%s2371_s3 + $0x98] sm:$0xff] (!%p191_p2)  ;;  %v435_v15 = vld [vmem:[%s2371_s3 + $0x190] sm:$0xff] (!%p191_p2)  ;;  %1525 = vmatprep.subr.bf16.mxu1 (!%p191_p2), %v1524_v8 }
   0xa   : > { %292 = vst [vmem:[#allocation2 + $0x50] sm:$0x1] (!%p191_p2), %v1685_v7  ;;  %293 = vst [vmem:[#allocation2 + $0x60] sm:$0x1] (!%p191_p2), %v1685_v7  ;;  %v436_v16 = vld [vmem:[%s2371_s3 + $0x198] sm:$0xff] (!%p191_p2)  ;;  %1495 = vmatpush3.bf16.msra.mxu0 (!%p191_p2), %v1494_v9  ;;  %v1496_v17 = vpack.c.bf16 (!%p191_p2), %v404_v14, %v403_v12  ;;  %v387_v19 = vld [vmem:[%s2371_s3 + $0x10] sm:$0xff] (!%p191_p2) }
   0xb   : > { %294 = vst [vmem:[#allocation2 + $0x70] sm:$0x1] (!%p191_p2), %v1685_v7  ;;  %295 = vst [vmem:[#allocation2 + $0x80] sm:$0x1] (!%p191_p2), %v1685_v7  ;;  %v1528_v18 = vpack.c.bf16 (!%p191_p2), %v436_v16, %v435_v15  ;;  %v388_v20 = vld [vmem:[%s2371_s3 + $0x18] sm:$0xff] (!%p191_p2)  ;;  %v419_v21 = vld [vmem:[%s2371_s3 + $0x110] sm:$0xff] (!%p191_p2)  ;;  %1527 = vmatpush3.bf16.msra.mxu1 (!%p191_p2), %v1526_v13 }
   0xc   : > { %296 = vst [vmem:[#allocation2 + $0x19] sm:$0x1] (!%p191_p2), %v1685_v7  ;;  %297 = vst [vmem:[#allocation2 + $0x29] sm:$0x1] (!%p191_p2), %v1685_v7  ;;  %v1498_v22 = vpack.c.bf16 (!%p191_p2), %v388_v20, %v387_v19  ;;  %v420_v23 = vld [vmem:[%s2371_s3 + $0x118] sm:$0xff] (!%p191_p2)  ;;  %v405_v24 = vld [vmem:[%s2371_s3 + $0xa0] sm:$0xff] (!%p191_p2)  ;;  %1497 = vmatprep.subr.bf16.mxu0 (!%p191_p2), %v1496_v17 }
   0xd   : > { %298 = vst [vmem:[#allocation2 + $0x39] sm:$0x1] %v1685_v7  ;;  %299 = vst [vmem:[#allocation2 + $0x49] sm:$0x1] %v1685_v7  ;;  %v406_v25 = vld [vmem:[%s2371_s3 + $0xa8] sm:$0xff]  ;;  %1529 = vmatprep.subr.bf16.mxu1 %v1528_v18  ;;  %v1530_v26 = vpack.c.bf16 %v420_v23, %v419_v21  ;;  %v437_v28 = vld [vmem:[%s2371_s3 + $0x1a0] sm:$0xff] }
   0xe   : > { %300 = vst [vmem:[#allocation2 + $0x59] sm:$0x1] %v1685_v7  ;;  %301 = vst [vmem:[#allocation2 + $0x69] sm:$0x1] %v1685_v7  ;;  %v1500_v27 = vpack.c.bf16 %v406_v25, %v405_v24  ;;  %v438_v29 = vld [vmem:[%s2371_s3 + $0x1a8] sm:$0xff]  ;;  %v389_v30 = vld [vmem:[%s2371_s3 + $0x20] sm:$0xff]  ;;  %1499 = vmatpush3.bf16.msra.mxu0 %v1498_v22 }
   0xf   : > { %302 = vst [vmem:[#allocation2 + $0x79] sm:$0x1] %v1685_v7  ;;  %303 = vst [vmem:[#allocation2 + $0x89] sm:$0x1] %v1685_v7  ;;  %v1532_v31 = vpack.c.bf16 %v438_v29, %v437_v28  ;;  %v390_v32 = vld [vmem:[%s2371_s3 + $0x28] sm:$0xff]  ;;  %v421_v33 = vld [vmem:[%s2371_s3 + $0x120] sm:$0xff]  ;;  %1531 = vmatpush3.bf16.msra.mxu1 %v1530_v26 }
  0x10   : > { %v422_v34 = vld [vmem:[%s2371_s3 + $0x128] sm:$0xff]  ;;  %v1502_v35 = vpack.c.bf16 %v390_v32, %v389_v30  ;;  %v407_v36 = vld [vmem:[%s2371_s3 + $0xb0] sm:$0xff]  ;;  %v408_v37 = vld [vmem:[%s2371_s3 + $0xb8] sm:$0xff]  ;;  %1501 = vmatprep.subr.bf16.mxu0 %v1500_v27  ;;  %s2376_s19 = smov (!%p1818_p3, %s1184_s19), 1 }
  0x11   : > { %v439_v38 = vld [vmem:[%s2371_s3 + $0x1b0] sm:$0xff]  ;;  %v1534_v39 = vpack.c.bf16 %v422_v34, %v421_v33  ;;  %v1504_v40 = vpack.c.bf16 %v408_v37, %v407_v36  ;;  %v440_v41 = vld [vmem:[%s2371_s3 + $0x1b8] sm:$0xff]  ;;  %1533 = vmatprep.subr.bf16.mxu1 %v1532_v31  ;;  %v409_v47 = vld [vmem:[%s2371_s3 + $0xc0] sm:$0xff]  ;;  %s1198_s15 = sshll.u32 %s2376_s19, 6 }
  0x12   : > { %v391_v42 = vld [vmem:[%s2371_s3 + $0x30] sm:$0xff]  ;;  %v392_v43 = vld [vmem:[%s2371_s3 + $0x38] sm:$0xff]  ;;  %v1536_v44 = vpack.c.bf16 %v440_v41, %v439_v38  ;;  %v410_v48 = vld [vmem:[%s2371_s3 + $0xc8] sm:$0xff]  ;;  %1503 = vmatpush3.bf16.msra.mxu0 %v1502_v35  ;;  %s1912_s7 = scalar_lea.vmem %s2368_s0, %s1198_s15  ;;  %s2351_s9 = scalar_lea.vmem %s2372_s4, %s1198_s15 }
  0x13   : > { %v423_v45 = vld [vmem:[%s2371_s3 + $0x130] sm:$0xff]  ;;  %v424_v46 = vld [vmem:[%s2371_s3 + $0x138] sm:$0xff]  ;;  %v441_v49 = vld [vmem:[%s2371_s3 + $0x1c0] sm:$0xff]  ;;  %v1506_v51 = vpack.c.bf16 %v392_v43, %v391_v42  ;;  %1535 = vmatpush3.bf16.msra.mxu1 %v1534_v39  ;;  %1505 = vmatprep.subr.bf16.mxu0 %v1504_v40  ;;  %v1508_v53 = vpack.c.bf16 %v410_v48, %v409_v47  ;;  %s1193_s15 = sshll.u32 %s2376_s19, 1 }
  0x14   : > { %v442_v50 = vld [vmem:[%s2371_s3 + $0x1c8] sm:$0xff]  ;;  %v1538_v52 = vpack.c.bf16 %v424_v46, %v423_v45  ;;  %v393_v54 = vld [vmem:[%s2371_s3 + $0x40] sm:$0xff]  ;;  %1537 = vmatprep.subr.bf16.mxu1 %v1536_v44  ;;  %v411_v59 = vld [vmem:[%s2371_s3 + $0xd0] sm:$0xff]  ;;  %s235_s12 = scalar_lea.vmem %s2373_s5, %s1193_s15 }
  0x15   : > { %v394_v55 = vld [vmem:[%s2371_s3 + $0x48] sm:$0xff]  ;;  %v425_v56 = vld [vmem:[%s2371_s3 + $0x140] sm:$0xff]  ;;  %v1540_v57 = vpack.c.bf16 %v442_v50, %v441_v49  ;;  %v412_v60 = vld [vmem:[%s2371_s3 + $0xd8] sm:$0xff] }
  0x16   : > { %v426_v58 = vld [vmem:[%s2371_s3 + $0x148] sm:$0xff]  ;;  %v443_v61 = vld [vmem:[%s2371_s3 + $0x1d0] sm:$0xff]  ;;  %v444_v62 = vld [vmem:[%s2371_s3 + $0x1d8] sm:$0xff]  ;;  %1507 = vmatpush3.bf16.msra.mxu0 %v1506_v51  ;;  %v1510_v63 = vpack.c.bf16 %v394_v55, %v393_v54  ;;  %v1512_v1 = vpack.c.bf16 %v412_v60, %v411_v59 }
  0x17   : > { %1539 = vmatpush3.bf16.msra.mxu1 %v1538_v52  ;;  %1509 = vmatprep.subr.bf16.mxu0 %v1508_v53  ;;  %v1542_v0 = vpack.c.bf16 %v426_v58, %v425_v56  ;;  %v395_v2 = vld [vmem:[%s2371_s3 + $0x50] sm:$0xff]  ;;  %v396_v3 = vld [vmem:[%s2371_s3 + $0x58] sm:$0xff]  ;;  %v1544_v5 = vpack.c.bf16 %v444_v62, %v443_v61  ;;  %v413_v8 = vld [vmem:[%s2371_s3 + $0xe0] sm:$0xff] }
  0x18   : > { %v427_v4 = vld [vmem:[%s2371_s3 + $0x150] sm:$0xff]  ;;  %1541 = vmatprep.subr.bf16.mxu1 %v1540_v57  ;;  %v428_v6 = vld [vmem:[%s2371_s3 + $0x158] sm:$0xff]  ;;  %v414_v9 = vld [vmem:[%s2371_s3 + $0xe8] sm:$0xff]  ;;  %v1514_v13 = vpack.c.bf16 %v396_v3, %v395_v2 }
  0x19   : > { %v445_v10 = vld [vmem:[%s2371_s3 + $0x1e0] sm:$0xff]  ;;  %v446_v11 = vld [vmem:[%s2371_s3 + $0x1e8] sm:$0xff]  ;;  %v1546_v17 = vpack.c.bf16 %v428_v6, %v427_v4  ;;  %v1516_v18 = vpack.c.bf16 %v414_v9, %v413_v8  ;;  %v415_v19 = vld [vmem:[%s2371_s3 + $0xf0] sm:$0xff] }
  0x1a   : > { %v397_v12 = vld [vmem:[%s2371_s3 + $0x60] sm:$0xff]  ;;  %1511 = vmatpush3.bf16.msra.mxu0 %v1510_v63  ;;  %v398_v14 = vld [vmem:[%s2371_s3 + $0x68] sm:$0xff]  ;;  %v1548_v22 = vpack.c.bf16 %v446_v11, %v445_v10  ;;  %v416_v23 = vld [vmem:[%s2371_s3 + $0xf8] sm:$0xff] }
  0x1b   : > { %v429_v15 = vld [vmem:[%s2371_s3 + $0x160] sm:$0xff]  ;;  %v430_v16 = vld [vmem:[%s2371_s3 + $0x168] sm:$0xff]  ;;  %1543 = vmatpush3.bf16.msra.mxu1 %v1542_v0  ;;  %1513 = vmatprep.subr.bf16.mxu0 %v1512_v1  ;;  %v447_v26 = vld [vmem:[%s2371_s3 + $0x1f0] sm:$0xff]  ;;  %v1518_v29 = vpack.c.bf16 %v398_v14, %v397_v12  ;;  %v1520_v32 = vpack.c.bf16 %v416_v23, %v415_v19 }
  0x1c   : > { %v320_v20 = vld [vmem:[#allocation2 + $0x1] sm:$0xff]  ;;  %1545 = vmatprep.subr.bf16.mxu1 %v1544_v5  ;;  %v1942_v24 = vld [vmem:[%s2369_s1] ss:$0 sm:$0xff]  ;;  %v448_v27 = vld [vmem:[%s2371_s3 + $0x1f8] sm:$0xff]  ;;  %v1550_v31 = vpack.c.bf16 %v430_v16, %v429_v15 }
  0x1d   : > { %v236_v21 = vld [vmem:[%s1912_s7] sm:$0xff]  ;;  %593 = vmatprep.mubr.f32.mxu0 %v320_v20  ;;  %v399_v30 = vld [vmem:[%s2371_s3 + $0x70] sm:$0xff]  ;;  %v400_v33 = vld [vmem:[%s2371_s3 + $0x78] sm:$0xff]  ;;  %v1552_v37 = vpack.c.bf16 %v448_v27, %v447_v26 }
  0x1e   : > { %v1947_v25 = vld [vmem:[%s2370_s2] ss:$0 sm:$0xff]  ;;  %v252_v28 = vmul.f32 %v1942_v24, %v236_v21  ;;  %1515 = vmatpush3.bf16.msra.mxu0 %v1514_v13  ;;  %v431_v34 = vld [vmem:[%s2371_s3 + $0x170] sm:$0xff]  ;;  %v237_v36 = vld [vmem:[%s1912_s7 + $0x8] sm:$0xff]  ;;  %v1522_v45 = vpack.c.bf16 %v400_v33, %v399_v30 }
  0x1f   : > { %1547 = vmatpush3.bf16.msra.mxu1 %v1546_v17  ;;  %1517 = vmatprep.subr.bf16.mxu0 %v1516_v18  ;;  %v432_v38 = vld [vmem:[%s2371_s3 + $0x178] sm:$0xff]  ;;  %v465_v39 = vld [vmem:[%s2371_s3 + $0x280] sm:$0xff]  ;;  %v466_v40 = vld [vmem:[%s2371_s3 + $0x288] sm:$0xff]  ;;  %v253_v41 = vmul.f32 %v1942_v24, %v237_v36 }
  0x20   : > { %v266_v35 = vadd.f32 %v1947_v25, %v252_v28  ;;  %1549 = vmatprep.subr.bf16.mxu1 %v1548_v22  ;;  %v497_v43 = vld [vmem:[%s2371_s3 + $0x380] sm:$0xff]  ;;  %v498_v44 = vld [vmem:[%s2371_s3 + $0x388] sm:$0xff]  ;;  %v238_v47 = vld [vmem:[%s1912_s7 + $0x10] sm:$0xff]  ;;  %v1554_v48 = vpack.c.bf16 %v432_v38, %v431_v34  ;;  %v1556_v49 = vpack.c.bf16 %v466_v40, %v465_v39 }
  0x21   : > { %v267_v46 = vadd.f32 %v1947_v25, %v253_v41  ;;  %v449_v50 = vld [vmem:[%s2371_s3 + $0x200] sm:$0xff]  ;;  %v450_v51 = vld [vmem:[%s2371_s3 + $0x208] sm:$0xff]  ;;  %v254_v52 = vmul.f32 %v1942_v24, %v238_v47  ;;  %v1588_v53 = vpack.c.bf16 %v498_v44, %v497_v43  ;;  %v467_v55 = vld [vmem:[%s2371_s3 + $0x290] sm:$0xff] }
  0x22   : > { %v1977_v42 = vmax.f32 %v266_v35, 0.0  ;;  %1519 = vmatpush3.bf16.msra.mxu0 %v1518_v29  ;;  %v468_v56 = vld [vmem:[%s2371_s3 + $0x298] sm:$0xff]  ;;  %v1558_v59 = vpack.c.bf16 %v450_v51, %v449_v50  ;;  %v481_v60 = vld [vmem:[%s2371_s3 + $0x300] sm:$0xff]  ;;  %v482_v61 = vld [vmem:[%s2371_s3 + $0x308] sm:$0xff] }
  0x23   : > { %1551 = vmatpush3.bf16.msra.mxu1 %v1550_v31  ;;  %1521 = vmatprep.subr.bf16.mxu0 %v1520_v32  ;;  %v1995_v54 = vmax.f32 %v267_v46, 0.0  ;;  %v268_v57 = vadd.f32 %v1947_v25, %v254_v52  ;;  %v239_v58 = vld [vmem:[%s1912_s7 + $0x18] sm:$0xff]  ;;  %v1560_v63 = vpack.c.bf16 %v468_v56, %v467_v55  ;;  %v499_v0 = vld [vmem:[%s2371_s3 + $0x390] sm:$0xff]  ;;  %v240_v6 = vld [vmem:[%s1912_s7 + $0x20] sm:$0xff]  ;;  %v1590_v9 = vpack.c.bf16 %v482_v61, %v481_v60 }
  0x24   : > { %304 = vst [vmem:[#allocation2 + $0x11] sm:$0xff] %v1977_v42  ;;  %1553 = vmatprep.subr.bf16.mxu1 %v1552_v37  ;;  %v255_v62 = vmul.f32 %v1942_v24, %v239_v58  ;;  %v500_v1 = vld [vmem:[%s2371_s3 + $0x398] sm:$0xff]  ;;  %v451_v3 = vld [vmem:[%s2371_s3 + $0x210] sm:$0xff]  ;;  %v328_v8 = vld [vmem:[#allocation2 + $0x2] sm:$0xff]  ;;  %v256_v12 = vmul.f32 %v1942_v24, %v240_v6 }
  0x25   : > { %305 = vst [vmem:[#allocation2 + $0x21] sm:$0xff] %v1995_v54  ;;  %v2019_v2 = vmax.f32 %v268_v57, 0.0  ;;  %v452_v4 = vld [vmem:[%s2371_s3 + $0x218] sm:$0xff]  ;;  %v469_v10 = vld [vmem:[%s2371_s3 + $0x2a0] sm:$0xff]  ;;  %v470_v11 = vld [vmem:[%s2371_s3 + $0x2a8] sm:$0xff]  ;;  %v1592_v14 = vpack.c.bf16 %v500_v1, %v499_v0 }
  0x26   : > { %1523 = vmatpush3.bf16.msra.mxu0 %v1522_v45  ;;  %v269_v5 = vadd.f32 %v1947_v25, %v255_v62  ;;  %v483_v15 = vld [vmem:[%s2371_s3 + $0x310] sm:$0xff]  ;;  %v484_v16 = vld [vmem:[%s2371_s3 + $0x318] sm:$0xff]  ;;  %v1562_v18 = vpack.c.bf16 %v452_v4, %v451_v3  ;;  %v501_v19 = vld [vmem:[%s2371_s3 + $0x3a0] sm:$0xff]  ;;  %v270_v22 = vadd.f32 %v1947_v25, %v256_v12  ;;  %v1564_v23 = vpack.c.bf16 %v470_v11, %v469_v10 }
  0x27   : > { %1555 = vmatpush3.bf16.msra.mxu1 %v1554_v48  ;;  %1557 = vmatprep.subr.bf16.mxu0 %v1556_v49  ;;  %306 = vst [vmem:[#allocation2 + $0x31] sm:$0xff] %v2019_v2  ;;  %v502_v20 = vld [vmem:[%s2371_s3 + $0x3a8] sm:$0xff]  ;;  %v453_v21 = vld [vmem:[%s2371_s3 + $0x220] sm:$0xff]  ;;  %v471_v27 = vld [vmem:[%s2371_s3 + $0x2b0] sm:$0xff]  ;;  %v1594_v31 = vpack.c.bf16 %v484_v16, %v483_v15 }
  0x28   : > { %1589 = vmatprep.subr.bf16.mxu1 %v1588_v53  ;;  %v2045_v17 = vmax.f32 %v269_v5, 0.0  ;;  %v454_v26 = vld [vmem:[%s2371_s3 + $0x228] sm:$0xff]  ;;  %v472_v32 = vld [vmem:[%s2371_s3 + $0x2b8] sm:$0xff]  ;;  %v2072_v33 = vmax.f32 %v270_v22, 0.0  ;;  %v1596_v35 = vpack.c.bf16 %v502_v20, %v501_v19  ;;  %v485_v36 = vld [vmem:[%s2371_s3 + $0x320] sm:$0xff] }
  0x29   : > { %594 = vmatmul.mubr.f32.vlgmr.msra.gmra.mrb[0].mxu0 %v1685_v7  ;;  %v241_v28 = vld [vmem:[%s1912_s7 + $0x28] sm:$0xff]  ;;  %v1566_v38 = vpack.c.bf16 %v454_v26, %v453_v21  ;;  %v503_v39 = vld [vmem:[%s2371_s3 + $0x3b0] sm:$0xff]  ;;  %v504_v40 = vld [vmem:[%s2371_s3 + $0x3b8] sm:$0xff]  ;;  %v1568_v45 = vpack.c.bf16 %v472_v32, %v471_v27 }
  0x2a   : > { %1559 = vmatpush3.bf16.msra.mxu0 %v1558_v59  ;;  %598 = vmatprep.mubr.f32.mxu0 %v1977_v42  ;;  %307 = vst [vmem:[#allocation2 + $0x41] sm:$0xff] %v2045_v17  ;;  %v257_v34 = vmul.f32 %v1942_v24, %v241_v28  ;;  %v486_v37 = vld [vmem:[%s2371_s3 + $0x328] sm:$0xff]  ;;  %v455_v41 = vld [vmem:[%s2371_s3 + $0x230] sm:$0xff]  ;;  %308 = vst [vmem:[#allocation2 + $0x51] sm:$0xff] %v2072_v33  ;;  %v1600_v55 = vpack.c.bf16 %v504_v40, %v503_v39 }
  0x2b   : > { %v336_v13 = vld [vmem:[#allocation2 + $0x10] sm:$0xff]  ;;  %1561 = vmatprep.subr.bf16.mxu0 %v1560_v63  ;;  %v456_v46 = vld [vmem:[%s2371_s3 + $0x238] sm:$0xff]  ;;  %v1598_v49 = vpack.c.bf16 %v486_v37, %v485_v36  ;;  %v473_v50 = vld [vmem:[%s2371_s3 + $0x2c0] sm:$0xff] }
  0x2c   : > { %698 = vmatprep.mubr.f32.mxu1 %v336_v13  ;;  %v2065_v29 = vld [vmem:[#allocation2 + $0x20] sm:$0xff]  ;;  %v2067_v30 = vld [vmem:[#allocation2 + $0x12] sm:$0xff]  ;;  %v271_v43 = vadd.f32 %v1947_v25, %v257_v34  ;;  %v474_v51 = vld [vmem:[%s2371_s3 + $0x2c8] sm:$0xff]  ;;  %v1570_v59 = vpack.c.bf16 %v456_v46, %v455_v41 }
  0x2d   : > { %699 = vmatmul.mubr.f32.vlgmr.msra.gmra.mrb[0].mxu1 %v328_v8  ;;  %599 = vmatmul.mubr.f32.gmra.mrb[2].mxu0 %v336_v13  ;;  %v242_v47 = vld [vmem:[%s1912_s7 + $0x30] sm:$0xff]  ;;  %v2102_v48 = vld [vmem:[#allocation2 + $0x22] sm:$0xff]  ;;  %v488_v57 = vld [vmem:[%s2371_s3 + $0x338] sm:$0xff]  ;;  %v1572_v63 = vpack.c.bf16 %v474_v51, %v473_v50 }
  0x2e   : > { %1591 = vmatpush3.bf16.msra.mxu1 %v1590_v9  ;;  %703 = vmatprep.mubr.f32.mxu1 %v2065_v29  ;;  %v2095_v44 = vld [vmem:[#allocation2 + $0x30] sm:$0xff]  ;;  %v2110_v52 = vmax.f32 %v271_v43, 0.0  ;;  %v258_v53 = vmul.f32 %v1942_v24, %v242_v47  ;;  %v505_v60 = vld [vmem:[%s2371_s3 + $0x3c0] sm:$0xff]  ;;  %v506_v61 = vld [vmem:[%s2371_s3 + $0x3c8] sm:$0xff] }
  0x2f   : > { %1593 = vmatprep.subr.bf16.mxu1 %v1592_v14  ;;  %1563 = vmatpush3.bf16.msra.mxu0 %v1562_v18  ;;  %v487_v56 = vld [vmem:[%s2371_s3 + $0x330] sm:$0xff]  ;;  %v457_v0 = vld [vmem:[%s2371_s3 + $0x240] sm:$0xff]  ;;  %v458_v1 = vld [vmem:[%s2371_s3 + $0x248] sm:$0xff]  ;;  %v1604_v12 = vpack.c.bf16 %v506_v61, %v505_v60 }
  0x30   : > { %603 = vmatprep.mubr.f32.mxu0 %v1995_v54  ;;  %1565 = vmatprep.subr.bf16.mxu0 %v1564_v23  ;;  %309 = vst [vmem:[#allocation2 + $0x61] sm:$0xff] %v2110_v52  ;;  %v272_v62 = vadd.f32 %v1947_v25, %v258_v53  ;;  %v243_v3 = vld [vmem:[%s1912_s7 + $0x38] sm:$0xff]  ;;  %v1602_v5 = vpack.c.bf16 %v488_v57, %v487_v56  ;;  %v475_v6 = vld [vmem:[%s2371_s3 + $0x2d0] sm:$0xff]  ;;  %v489_v13 = vld [vmem:[%s2371_s3 + $0x340] sm:$0xff] }
  0x31   : > { %704 = vmatmul.mubr.f32.gmra.mrb[2].mxu1 %v2067_v30  ;;  %604 = vmatmul.mubr.f32.gmra.mrb[4].mxu0 %v2065_v29  ;;  %v2121_v58 = vld [vmem:[#allocation2 + $0x40] sm:$0xff]  ;;  %v2140_v4 = vld [vmem:[#allocation2 + $0x32] sm:$0xff]  ;;  %v259_v10 = vmul.f32 %v1942_v24, %v243_v3  ;;  %v490_v14 = vld [vmem:[%s2371_s3 + $0x348] sm:$0xff]  ;;  %v1574_v15 = vpack.c.bf16 %v458_v1, %v457_v0 }
  0x32   : > { %1595 = vmatpush3.bf16.msra.mxu1 %v1594_v31  ;;  %708 = vmatprep.mubr.f32.mxu1 %v2095_v44  ;;  %v476_v8 = vld [vmem:[%s2371_s3 + $0x2d8] sm:$0xff]  ;;  %v2148_v9 = vmax.f32 %v272_v62, 0.0  ;;  %v2152_v11 = vld [vmem:[#allocation2 + $0x50] sm:$0xff]  ;;  %v2177_v22 = vld [vmem:[#allocation2 + $0x42] sm:$0xff]  ;;  %v1606_v23 = vpack.c.bf16 %v490_v14, %v489_v13 }
  0x33   : > { %1597 = vmatprep.subr.bf16.mxu1 %v1596_v35  ;;  %1567 = vmatpush3.bf16.msra.mxu0 %v1566_v38  ;;  %v507_v24 = vld [vmem:[%s2371_s3 + $0x3d0] sm:$0xff]  ;;  %v508_v16 = vld [vmem:[%s2371_s3 + $0x3d8] sm:$0xff]  ;;  %v273_v18 = vadd.f32 %v1947_v25, %v259_v10  ;;  %v1576_v19 = vpack.c.bf16 %v476_v8, %v475_v6  ;;  %v477_v25 = vld [vmem:[%s2371_s3 + $0x2e0] sm:$0xff] }
  0x34   : > { %608 = vmatprep.mubr.f32.mxu0 %v2019_v2  ;;  %1569 = vmatprep.subr.bf16.mxu0 %v1568_v45  ;;  %310 = vst [vmem:[#allocation2 + $0x71] sm:$0xff] %v2148_v9  ;;  %v459_v20 = vld [vmem:[%s2371_s3 + $0x250] sm:$0xff]  ;;  %v460_v21 = vld [vmem:[%s2371_s3 + $0x258] sm:$0xff]  ;;  %v478_v26 = vld [vmem:[%s2371_s3 + $0x2e8] sm:$0xff]  ;;  %v1608_v31 = vpack.c.bf16 %v508_v16, %v507_v24 }
  0x35   : > { %709 = vmatmul.mubr.f32.gmra.mrb[4].mxu1 %v2102_v48  ;;  %609 = vmatmul.mubr.f32.gmra.mrb[6].mxu0 %v2095_v44  ;;  %v2185_v27 = vmax.f32 %v273_v18, 0.0  ;;  %v491_v32 = vld [vmem:[%s2371_s3 + $0x350] sm:$0xff]  ;;  %v492_v34 = vld [vmem:[%s2371_s3 + $0x358] sm:$0xff]  ;;  %v1578_v35 = vpack.c.bf16 %v460_v21, %v459_v20  ;;  %v509_v36 = vld [vmem:[%s2371_s3 + $0x3e0] sm:$0xff]  ;;  %v1580_v38 = vpack.c.bf16 %v478_v26, %v477_v25 }
  0x36   : > { %1599 = vmatpush3.bf16.msra.mxu1 %v1598_v49  ;;  %713 = vmatprep.mubr.f32.mxu1 %v2121_v58  ;;  %v510_v37 = vld [vmem:[%s2371_s3 + $0x3e8] sm:$0xff]  ;;  %v461_v39 = vld [vmem:[%s2371_s3 + $0x260] sm:$0xff]  ;;  %v2212_v41 = vld [vmem:[#allocation2 + $0x52] sm:$0xff]  ;;  %v1610_v43 = vpack.c.bf16 %v492_v34, %v491_v32 }
  0x37   : > { %1601 = vmatprep.subr.bf16.mxu1 %v1600_v55  ;;  %1571 = vmatpush3.bf16.msra.mxu0 %v1570_v59  ;;  %v2188_v28 = vld [vmem:[#allocation2 + $0x60] sm:$0xff]  ;;  %311 = vst [vmem:[#allocation2 + $0x81] sm:$0xff] %v2185_v27  ;;  %v462_v40 = vld [vmem:[%s2371_s3 + $0x268] sm:$0xff]  ;;  %v479_v45 = vld [vmem:[%s2371_s3 + $0x2f0] sm:$0xff]  ;;  %v1612_v49 = vpack.c.bf16 %v510_v37, %v509_v36 }
  0x38   : > { %613 = vmatprep.mubr.f32.mxu0 %v2045_v17  ;;  %1573 = vmatprep.subr.bf16.mxu0 %v1572_v63  ;;  %v480_v46 = vld [vmem:[%s2371_s3 + $0x2f8] sm:$0xff]  ;;  %v493_v50 = vld [vmem:[%s2371_s3 + $0x360] sm:$0xff]  ;;  %v494_v51 = vld [vmem:[%s2371_s3 + $0x368] sm:$0xff]  ;;  %v1582_v53 = vpack.c.bf16 %v462_v40, %v461_v39 }
  0x39   : > { %714 = vmatmul.mubr.f32.gmra.mrb[6].mxu1 %v2140_v4  ;;  %614 = vmatmul.mubr.f32.gmra.mrb[8].mxu0 %v2121_v58  ;;  %v511_v55 = vld [vmem:[%s2371_s3 + $0x3f0] sm:$0xff]  ;;  %v512_v56 = vld [vmem:[%s2371_s3 + $0x3f8] sm:$0xff]  ;;  %v1584_v57 = vpack.c.bf16 %v480_v46, %v479_v45  ;;  %v2244_v61 = vld [vmem:[#allocation2 + $0x62] sm:$0xff]  ;;  %v1614_v62 = vpack.c.bf16 %v494_v51, %v493_v50 }
  0x3a   : > { %1603 = vmatpush3.bf16.msra.mxu1 %v1602_v5  ;;  %718 = vmatprep.mubr.f32.mxu1 %v2152_v11  ;;  %v463_v59 = vld [vmem:[%s2371_s3 + $0x270] sm:$0xff]  ;;  %v464_v60 = vld [vmem:[%s2371_s3 + $0x278] sm:$0xff]  ;;  %v513_v63 = vld [vmem:[%s2371_s3 + $0x400] sm:$0xff]  ;;  %v1616_v3 = vpack.c.bf16 %v512_v56, %v511_v55 }
  0x3b   : > { %1605 = vmatprep.subr.bf16.mxu1 %v1604_v12  ;;  %1575 = vmatpush3.bf16.msra.mxu0 %v1574_v15  ;;  %v2221_v47 = vld [vmem:[#allocation2 + $0x70] sm:$0xff]  ;;  %v514_v0 = vld [vmem:[%s2371_s3 + $0x408] sm:$0xff]  ;;  %v496_v6 = vld [vmem:[%s2371_s3 + $0x378] sm:$0xff]  ;;  %v1586_v8 = vpack.c.bf16 %v464_v60, %v463_v59 }
  0x3c   : > { %618 = vmatprep.mubr.f32.mxu0 %v2072_v33  ;;  %1577 = vmatprep.subr.bf16.mxu0 %v1576_v19  ;;  %v495_v5 = vld [vmem:[%s2371_s3 + $0x370] sm:$0xff]  ;;  %v1620_v10 = vpack.c.bf16 %v514_v0, %v513_v63  ;;  %v516_v15 = vld [vmem:[%s2371_s3 + $0x418] sm:$0xff]  ;;  %v517_v16 = vld [vmem:[%s2371_s3 + $0x420] sm:$0xff] }
  0x3d   : > { %719 = vmatmul.mubr.f32.gmra.mrb[8].mxu1 %v2177_v22  ;;  %619 = vmatmul.mubr.f32.gmra.mrb[10].mxu0 %v2152_v11  ;;  %v2264_v12 = vld [vmem:[#allocation2 + $0x72] sm:$0xff]  ;;  %v1618_v13 = vpack.c.bf16 %v496_v6, %v495_v5  ;;  %v518_v18 = vld [vmem:[%s2371_s3 + $0x428] sm:$0xff] }
  0x3e   : > { %1607 = vmatpush3.bf16.msra.mxu1 %v1606_v23  ;;  %723 = vmatprep.mubr.f32.mxu1 %v2188_v28  ;;  %v2253_v1 = vld [vmem:[#allocation2 + $0x80] sm:$0xff]  ;;  %v515_v14 = vld [vmem:[%s2371_s3 + $0x410] sm:$0xff]  ;;  %v520_v20 = vld [vmem:[%s2371_s3 + $0x438] sm:$0xff] }
  0x3f   : > { %1609 = vmatprep.subr.bf16.mxu1 %v1608_v31  ;;  %1579 = vmatpush3.bf16.msra.mxu0 %v1578_v35  ;;  %v1624_v24 = vpack.c.bf16 %v516_v15, %v515_v14  ;;  %v519_v19 = vld [vmem:[%s2371_s3 + $0x430] sm:$0xff]  ;;  %v522_v21 = vld [vmem:[%s2371_s3 + $0x448] sm:$0xff]  ;;  %v524_v23 = vld [vmem:[%s2371_s3 + $0x458] sm:$0xff] }
  0x40   : > { %623 = vmatprep.mubr.f32.mxu0 %v2110_v52  ;;  %1581 = vmatprep.subr.bf16.mxu0 %v1580_v38  ;;  %v526_v25 = vld [vmem:[%s2371_s3 + $0x468] sm:$0xff]  ;;  %v528_v26 = vld [vmem:[%s2371_s3 + $0x478] sm:$0xff] }
  0x41   : > { %724 = vmatmul.mubr.f32.gmra.mrb[10].mxu1 %v2212_v41  ;;  %624 = vmatmul.mubr.f32.gmra.mrb[12].mxu0 %v2188_v28  ;;  %v376_v31 = vld [vmem:[#allocation2 + $0x91] sm:$0xff] }
  0x42   : > { %1611 = vmatpush3.bf16.msra.mxu1 %v1610_v43  ;;  %728 = vmatprep.mubr.f32.mxu1 %v2221_v47 }
  0x43   : > { %1613 = vmatprep.subr.bf16.mxu1 %v1612_v49  ;;  %1583 = vmatpush3.bf16.msra.mxu0 %v1582_v53 }
  0x44   : > { %628 = vmatprep.mubr.f32.mxu0 %v2148_v9  ;;  %1585 = vmatprep.subr.bf16.mxu0 %v1584_v57 }
  0x45   : > { %729 = vmatmul.mubr.f32.gmra.mrb[12].mxu1 %v2244_v61  ;;  %629 = vmatmul.mubr.f32.gmra.mrb[14].mxu0 %v2221_v47 }
  0x46   : > { %1615 = vmatpush3.bf16.msra.mxu1 %v1614_v62  ;;  %733 = vmatprep.mubr.f32.mxu1 %v2253_v1 }
  0x47   : > { %1617 = vmatprep.subr.bf16.mxu1 %v1616_v3  ;;  %1587 = vmatpush3.bf16.msra.mxu0 %v1586_v8 }
  0x48   : > { %803 = vmatprep.mubr.f32.mxu0 %v2067_v30  ;;  %1621 = vmatprep.subr.bf16.mxu0 %v1620_v10  ;;  %v1628_v30 = vpack.c.bf16 %v518_v18, %v517_v16 }
  0x49   : > { %734 = vmatmul.mubr.f32.gmra.mrb[14].mxu1 %v2264_v12 }
  0x4a   : > { %1619 = vmatpush3.bf16.msra.mxu1 %v1618_v13  ;;  %908 = vmatprep.mubr.f32.mxu1 %v1995_v54 }
  0x4b   : > { %804 = vmatmul.mubr.f32.vlgmr.msra.gmra.mrb[16].mxu0 %v1977_v42  ;;  %1652 = vmatprep.subr.bf16.mxu1 %v1620_v10  ;;  %v1632_v42 = vpack.c.bf16 %v520_v20, %v519_v19 }
  0x4c   : > { %1623 = vmatpush3.bf16.msra.mxu0 %v1620_v10  ;;  %808 = vmatprep.mubr.f32.mxu0 %v2102_v48 }
  0x4d   : > { %909 = vmatmul.mubr.f32.vlgmr.msra.gmra.mrb[16].mxu1 %v2065_v29  ;;  %1625 = vmatprep.subr.bf16.mxu0 %v1624_v24  ;;  %v521_v29 = vld [vmem:[%s2371_s3 + $0x440] sm:$0xff] }
  0x4e   : > { %1660 = vmatpush3.bf16.msra.mxu1 %v1620_v10  ;;  %913 = vmatprep.mubr.f32.mxu1 %v2019_v2 }
  0x4f   : > { %809 = vmatmul.mubr.f32.gmra.mrb[18].mxu0 %v1995_v54  ;;  %1653 = vmatprep.subr.bf16.mxu1 %v1624_v24  ;;  %v1636_v54 = vpack.c.bf16 %v522_v21, %v521_v29 }
  0x50   : > { %1627 = vmatpush3.bf16.msra.mxu0 %v1624_v24  ;;  %813 = vmatprep.mubr.f32.mxu0 %v2140_v4 }
  0x51   : > { %914 = vmatmul.mubr.f32.gmra.mrb[18].mxu1 %v2095_v44  ;;  %1629 = vmatprep.subr.bf16.mxu0 %v1628_v30  ;;  %v523_v44 = vld [vmem:[%s2371_s3 + $0x450] sm:$0xff] }
  0x52   : > { %1661 = vmatpush3.bf16.msra.mxu1 %v1624_v24  ;;  %918 = vmatprep.mubr.f32.mxu1 %v2045_v17 }
  0x53   : > { %814 = vmatmul.mubr.f32.gmra.mrb[20].mxu0 %v2019_v2  ;;  %1654 = vmatprep.subr.bf16.mxu1 %v1628_v30  ;;  %v1640_v2 = vpack.c.bf16 %v524_v23, %v523_v44 }
  0x54   : > { %1631 = vmatpush3.bf16.msra.mxu0 %v1628_v30  ;;  %818 = vmatprep.mubr.f32.mxu0 %v2177_v22 }
  0x55   : > { %919 = vmatmul.mubr.f32.gmra.mrb[20].mxu1 %v2121_v58  ;;  %1633 = vmatprep.subr.bf16.mxu0 %v1632_v42  ;;  %v525_v58 = vld [vmem:[%s2371_s3 + $0x460] sm:$0xff] }
  0x56   : > { %1662 = vmatpush3.bf16.msra.mxu1 %v1628_v30  ;;  %923 = vmatprep.mubr.f32.mxu1 %v2072_v33 }
  0x57   : > { %819 = vmatmul.mubr.f32.gmra.mrb[22].mxu0 %v2045_v17  ;;  %1655 = vmatprep.subr.bf16.mxu1 %v1632_v42  ;;  %v1644_v17 = vpack.c.bf16 %v526_v25, %v525_v58 }
  0x58   : > { %1635 = vmatpush3.bf16.msra.mxu0 %v1632_v42  ;;  %823 = vmatprep.mubr.f32.mxu0 %v2212_v41 }
  0x59   : > { %924 = vmatmul.mubr.f32.gmra.mrb[22].mxu1 %v2152_v11  ;;  %1637 = vmatprep.subr.bf16.mxu0 %v1636_v54  ;;  %v527_v11 = vld [vmem:[%s2371_s3 + $0x470] sm:$0xff] }
  0x5a   : > { %1663 = vmatpush3.bf16.msra.mxu1 %v1632_v42  ;;  %928 = vmatprep.mubr.f32.mxu1 %v2110_v52 }
  0x5b   : > { %824 = vmatmul.mubr.f32.gmra.mrb[24].mxu0 %v2072_v33  ;;  %1656 = vmatprep.subr.bf16.mxu1 %v1636_v54  ;;  %v359_v33 = vld [vmem:[#allocation2 + $0x82] sm:$0xff] }
  0x5c   : > { %1639 = vmatpush3.bf16.msra.mxu0 %v1636_v54  ;;  %828 = vmatprep.mubr.f32.mxu0 %v2244_v61 }
  0x5d   : > { %929 = vmatmul.mubr.f32.gmra.mrb[24].mxu1 %v2188_v28  ;;  %1641 = vmatprep.subr.bf16.mxu0 %v1640_v2  ;;  %v1648_v28 = vpack.c.bf16 %v528_v26, %v527_v11 }
  0x5e   : > { %1664 = vmatpush3.bf16.msra.mxu1 %v1636_v54  ;;  %933 = vmatprep.mubr.f32.mxu1 %v2148_v9 }
  0x5f   : > { %829 = vmatmul.mubr.f32.gmra.mrb[26].mxu0 %v2110_v52  ;;  %1657 = vmatprep.subr.bf16.mxu1 %v1640_v2  ;;  %v384_v52 = vld [vmem:[#allocation2 + $0x92] sm:$0xff] }
  0x60   : > { %1643 = vmatpush3.bf16.msra.mxu0 %v1640_v2  ;;  %833 = vmatprep.mubr.f32.mxu0 %v2264_v12 }
  0x61   : > { %934 = vmatmul.mubr.f32.gmra.mrb[26].mxu1 %v2221_v47  ;;  %1645 = vmatprep.subr.bf16.mxu0 %v1644_v17 }
  0x62   : > { %1665 = vmatpush3.bf16.msra.mxu1 %v1640_v2  ;;  %938 = vmatprep.mubr.f32.mxu1 %v2185_v27 }
  0x63   : > { %834 = vmatmul.mubr.f32.gmra.mrb[28].mxu0 %v2148_v9  ;;  %1658 = vmatprep.subr.bf16.mxu1 %v1644_v17 }
  0x64   : > { %1647 = vmatpush3.bf16.msra.mxu0 %v1644_v17  ;;  %838 = vmatprep.mubr.f32.mxu0 %v359_v33 }
  0x65   : > { %939 = vmatmul.mubr.f32.gmra.mrb[28].mxu1 %v2253_v1  ;;  %1649 = vmatprep.subr.bf16.mxu0 %v1648_v28 }
  0x66   : > { %1666 = vmatpush3.bf16.msra.mxu1 %v1644_v17  ;;  %943 = vmatprep.mubr.f32.mxu1 %v376_v31 }
  0x67   : > { %839 = vmatmul.mubr.f32.gmra.mrb[30].mxu0 %v2185_v27  ;;  %1659 = vmatprep.subr.bf16.mxu1 %v1648_v28 }
  0x68   : > { %1651 = vmatpush3.bf16.msra.mxu0 %v1648_v28  ;;  %1480 = vmatprep.mubr.f32.mxu0 %v2102_v48 }
  0x69   : > { %944 = vmatmul.mubr.f32.gmra.mrb[30].mxu1 %v1685_v7 }
  0x6a   : > { %1667 = vmatpush3.bf16.msra.mxu1 %v1648_v28  ;;  %1486 = vmatprep.mubr.f32.mxu1 %v2244_v61 }
  0x6b   : > { %1481 = vmatmul.mubr.f32.vlgmr.msra.gmra.mrb[32].mxu0 %v2140_v4 }
  0x6c   : > { %1483 = vmatprep.mubr.f32.mxu0 %v2177_v22 }
  0x6d   : > { %1487 = vmatmul.mubr.f32.vlgmr.msra.gmra.mrb[32].mxu1 %v2264_v12 }
  0x6e   : > { %1489 = vmatprep.mubr.f32.mxu1 %v359_v33 }
  0x6f   : > { %1484 = vmatmul.mubr.f32.gmra.mrb[34].mxu0 %v2212_v41 }
  0x71   : > { %1490 = vmatmul.mubr.f32.gmra.mrb[34].mxu1 %v384_v52 }
  0xfc   : > { %v1232_v9 = vpop.f32.mrb[0].mxu0 }
  0xfd   : > { %v1233_v27 = vpop.f32.mrb[1].mxu0 }
  0xfe   : > { %v1234_v32 = vadd.f32 %v1233_v27, %v1232_v9 }
 0x100   : > { %v1288_v48 = vpop.f32.mrb[0].mxu1  ;;  %v1235_v7 = vpop.f32.mrb[2].mxu0 }
 0x101   : > { %v1289_v34 = vpop.f32.mrb[1].mxu1  ;;  %v1236_v36 = vpop.f32.mrb[3].mxu0 }
 0x102   : > { %v1290_v35 = vadd.f32 %v1289_v34, %v1288_v48  ;;  %v1237_v37 = vadd.f32 %v1236_v36, %v1235_v7 }
 0x104   : > { %v701_v38 = vadd.f32 %v1290_v35, %v1234_v32  ;;  %v1291_v4 = vpop.f32.mrb[2].mxu1  ;;  %v1238_v40 = vpop.f32.mrb[4].mxu0 }
 0x105   : > { %v1292_v39 = vpop.f32.mrb[3].mxu1  ;;  %v1239_v43 = vpop.f32.mrb[5].mxu0 }
 0x106   : > { %v1293_v22 = vadd.f32 %v1292_v39, %v1291_v4  ;;  %v1240_v47 = vadd.f32 %v1239_v43, %v1238_v40 }
 0x108   : > { %v706_v45 = vadd.f32 %v1293_v22, %v1237_v37  ;;  %v1294_v46 = vpop.f32.mrb[4].mxu1  ;;  %v1241_v50 = vpop.f32.mrb[6].mxu0 }
 0x109   : > { %v1295_v41 = vpop.f32.mrb[5].mxu1  ;;  %v1242_v51 = vpop.f32.mrb[7].mxu0 }
 0x10a   : > { %v1296_v49 = vadd.f32 %v1295_v41, %v1294_v46  ;;  %v1243_v56 = vadd.f32 %v1242_v51, %v1241_v50 }
 0x10c   : > { %v711_v53 = vadd.f32 %v1296_v49, %v1240_v47  ;;  %v1297_v55 = vpop.f32.mrb[6].mxu1  ;;  %v1244_v60 = vpop.f32.mrb[8].mxu0 }
 0x10d   : > { %v1298_v57 = vpop.f32.mrb[7].mxu1  ;;  %v1245_v61 = vpop.f32.mrb[9].mxu0 }
 0x10e   : > { %v1299_v59 = vadd.f32 %v1298_v57, %v1297_v55  ;;  %v1246_v0 = vadd.f32 %v1245_v61, %v1244_v60 }
 0x110   : > { %v716_v62 = vadd.f32 %v1299_v59, %v1243_v56  ;;  %v1300_v63 = vpop.f32.mrb[8].mxu1  ;;  %v1247_v5 = vpop.f32.mrb[10].mxu0 }
 0x111   : > { %v1301_v1 = vpop.f32.mrb[9].mxu1  ;;  %v1248_v6 = vpop.f32.mrb[11].mxu0 }
 0x112   : > { %v1302_v3 = vadd.f32 %v1301_v1, %v1300_v63  ;;  %v1249_v12 = vadd.f32 %v1248_v6, %v1247_v5 }
 0x114   : > { %v721_v8 = vadd.f32 %v1302_v3, %v1246_v0  ;;  %v1303_v10 = vpop.f32.mrb[10].mxu1  ;;  %v1250_v15 = vpop.f32.mrb[12].mxu0 }
 0x115   : > { %v1304_v13 = vpop.f32.mrb[11].mxu1  ;;  %v1251_v24 = vpop.f32.mrb[13].mxu0 }
 0x116   : > { %v1305_v14 = vadd.f32 %v1304_v13, %v1303_v10  ;;  %v1252_v30 = vadd.f32 %v1251_v24, %v1250_v15 }
 0x118   : > { %v726_v16 = vadd.f32 %v1305_v14, %v1249_v12  ;;  %v1306_v18 = vpop.f32.mrb[12].mxu1  ;;  %v1253_v42 = vpop.f32.mrb[14].mxu0 }
 0x119   : > { %v1307_v19 = vpop.f32.mrb[13].mxu1  ;;  %v1254_v29 = vpop.f32.mrb[15].mxu0 }
 0x11a   : > { %v1308_v20 = vadd.f32 %v1307_v19, %v1306_v18  ;;  %v1255_v44 = vadd.f32 %v1254_v29, %v1253_v42 }
 0x11c   : > { %v731_v21 = vadd.f32 %v1308_v20, %v1252_v30  ;;  %v1309_v54 = vpop.f32.mrb[14].mxu1 }
 0x11d   : > { %v1310_v23 = vpop.f32.mrb[15].mxu1 }
 0x11e   : > { %v1311_v2 = vadd.f32 %v1310_v23, %v1309_v54  ;;  %v1344_v58 = vpop.f32.mrb[16].mxu0 }
 0x11f   : > { %v1345_v25 = vpop.f32.mrb[17].mxu0 }
 0x120   : > { %v736_v17 = vadd.f32 %v1311_v2, %v1255_v44  ;;  %v1346_v11 = vadd.f32 %v1345_v25, %v1344_v58  ;;  %v1400_v26 = vpop.f32.mrb[16].mxu1 }
 0x121   : > { %v1401_v33 = vpop.f32.mrb[17].mxu1 }
 0x122   : > { %v806_v28 = vadd.f32 %v1346_v11, %v701_v38  ;;  %v1402_v31 = vadd.f32 %v1401_v33, %v1400_v26  ;;  %v1347_v52 = vpop.f32.mrb[18].mxu0 }
 0x123   : > { %v1348_v9 = vpop.f32.mrb[19].mxu0 }
 0x124   : > { %v1349_v27 = vadd.f32 %v1348_v9, %v1347_v52  ;;  %v1403_v32 = vpop.f32.mrb[18].mxu1  ;;  %v911_v48 = vadd.f32 %v1402_v31, %v806_v28 }
 0x125   : > { %v1404_v34 = vpop.f32.mrb[19].mxu1 }
 0x126   : > { %v811_v7 = vadd.f32 %v1349_v27, %v706_v45  ;;  %v1405_v35 = vadd.f32 %v1404_v34, %v1403_v32  ;;  %v1350_v36 = vpop.f32.mrb[20].mxu0 }
 0x127   : > { %v1351_v37 = vpop.f32.mrb[21].mxu0 }
 0x128   : > { %v1352_v4 = vadd.f32 %v1351_v37, %v1350_v36  ;;  %v1406_v39 = vpop.f32.mrb[20].mxu1  ;;  %v916_v22 = vadd.f32 %v1405_v35, %v811_v7 }
 0x129   : > { %v1407_v40 = vpop.f32.mrb[21].mxu1 }
 0x12a   : > { %v816_v43 = vadd.f32 %v1352_v4, %v711_v53  ;;  %v1408_v46 = vadd.f32 %v1407_v40, %v1406_v39  ;;  %v1353_v47 = vpop.f32.mrb[22].mxu0 }
 0x12b   : > { %v1354_v41 = vpop.f32.mrb[23].mxu0 }
 0x12c   : > { %v1355_v38 = vadd.f32 %v1354_v41, %v1353_v47  ;;  %v1409_v49 = vpop.f32.mrb[22].mxu1  ;;  %v921_v50 = vadd.f32 %v1408_v46, %v816_v43 }
 0x12d   : > { %v1410_v51 = vpop.f32.mrb[23].mxu1 }
 0x12e   : > { %v821_v55 = vadd.f32 %v1355_v38, %v716_v62  ;;  %v1411_v56 = vadd.f32 %v1410_v51, %v1409_v49  ;;  %v1356_v57 = vpop.f32.mrb[24].mxu0 }
 0x12f   : > { %v1357_v59 = vpop.f32.mrb[25].mxu0 }
 0x130   : > { %v1358_v45 = vadd.f32 %v1357_v59, %v1356_v57  ;;  %v1412_v60 = vpop.f32.mrb[24].mxu1  ;;  %v926_v61 = vadd.f32 %v1411_v56, %v821_v55 }
 0x131   : > { %v1413_v63 = vpop.f32.mrb[25].mxu1 }
 0x132   : > { %v826_v0 = vadd.f32 %v1358_v45, %v721_v8  ;;  %v1414_v1 = vadd.f32 %v1413_v63, %v1412_v60  ;;  %v1359_v3 = vpop.f32.mrb[26].mxu0 }
 0x133   : > { %v1360_v5 = vpop.f32.mrb[27].mxu0 }
 0x134   : > { %v1361_v53 = vadd.f32 %v1360_v5, %v1359_v3  ;;  %v1415_v6 = vpop.f32.mrb[26].mxu1  ;;  %v931_v10 = vadd.f32 %v1414_v1, %v826_v0 }
 0x135   : > { %v1416_v12 = vpop.f32.mrb[27].mxu1 }
 0x136   : > { %v831_v13 = vadd.f32 %v1361_v53, %v726_v16  ;;  %v1417_v14 = vadd.f32 %v1416_v12, %v1415_v6  ;;  %v1362_v15 = vpop.f32.mrb[28].mxu0 }
 0x137   : > { %v1363_v62 = vpop.f32.mrb[29].mxu0 }
 0x138   : > { %v1364_v24 = vadd.f32 %v1363_v62, %v1362_v15  ;;  %v1418_v18 = vpop.f32.mrb[28].mxu1  ;;  %v936_v30 = vadd.f32 %v1417_v14, %v831_v13 }
 0x139   : > { %v1419_v19 = vpop.f32.mrb[29].mxu1 }
 0x13a   : > { %v836_v20 = vadd.f32 %v1364_v24, %v731_v21  ;;  %v1420_v42 = vadd.f32 %v1419_v19, %v1418_v18  ;;  %v1365_v29 = vpop.f32.mrb[30].mxu0 }
 0x13b   : > { %v1366_v8 = vpop.f32.mrb[31].mxu0 }
 0x13c   : > { %v1367_v54 = vadd.f32 %v1366_v8, %v1365_v29  ;;  %v1421_v44 = vpop.f32.mrb[30].mxu1  ;;  %v941_v23 = vadd.f32 %v1420_v42, %v836_v20 }
 0x13d   : > { %v1422_v2 = vpop.f32.mrb[31].mxu1 }
 0x13e   : > { %v841_v58 = vadd.f32 %v1367_v54, %v736_v17  ;;  %v1423_v25 = vadd.f32 %v1422_v2, %v1421_v44  ;;  %v1482_v16 = vpop.f32.mrb[32].mxu0 }
 0x13f   : > { %v1021_v21 = vadd.f32 %v1482_v16, %v916_v22  ;;  %v1015_v11 = vpop.f32.mrb[33].mxu0 }
 0x140   : > { %v1488_v26 = vpop.f32.mrb[32].mxu1  ;;  %v1016_v33 = vadd.f32 %v1015_v11, %v911_v48  ;;  %v946_v28 = vadd.f32 %v1423_v25, %v841_v58 }
 0x141   : > { %1055 = vst [vmem:[%s2351_s9 + $0x8] sm:$0xff] %v1021_v21  ;;  %v1077_v17 = vmul.f32 %v1021_v21, %v1021_v21  ;;  %v1041_v31 = vadd.f32 %v1488_v26, %v936_v30  ;;  %v1035_v52 = vpop.f32.mrb[33].mxu1 }
 0x142   : > { %1054 = vst [vmem:[%s2351_s9] sm:$0xff] %v1016_v33  ;;  %v1062_v9 = vadd.f32 %v1021_v21, %v1016_v33  ;;  %v1076_v27 = vmul.f32 %v1016_v33, %v1016_v33  ;;  %v1036_v32 = vadd.f32 %v1035_v52, %v931_v10  ;;  %v1485_v34 = vpop.f32.mrb[34].mxu0 }
 0x143   : > { %1059 = vst [vmem:[%s2351_s9 + $0x28] sm:$0xff] %v1041_v31  ;;  %v1031_v7 = vadd.f32 %v1485_v34, %v926_v61  ;;  %v1025_v35 = vpop.f32.mrb[35].mxu0  ;;  %v1081_v55 = vmul.f32 %v1041_v31, %v1041_v31 }
 0x144   : > { %v1084_v36 = vadd.f32 %v1077_v17, %v1076_v27  ;;  %1058 = vst [vmem:[%s2351_s9 + $0x20] sm:$0xff] %v1036_v32  ;;  %v1491_v48 = vpop.f32.mrb[34].mxu1  ;;  %v1026_v37 = vadd.f32 %v1025_v35, %v921_v50  ;;  %v1080_v38 = vmul.f32 %v1036_v32, %v1036_v32 }
 0x145   : > { %1057 = vst [vmem:[%s2351_s9 + $0x18] sm:$0xff] %v1031_v7  ;;  %v1051_v4 = vadd.f32 %v1491_v48, %v946_v28  ;;  %v1045_v39 = vpop.f32.mrb[35].mxu1  ;;  %v1079_v46 = vmul.f32 %v1031_v7, %v1031_v7 }
 0x146   : > { %1056 = vst [vmem:[%s2351_s9 + $0x10] sm:$0xff] %v1026_v37  ;;  %v1063_v22 = vadd.f32 %v1062_v9, %v1026_v37  ;;  %v1078_v40 = vmul.f32 %v1026_v37, %v1026_v37  ;;  %v1046_v43 = vadd.f32 %v1045_v39, %v941_v23 }
 0x147   : > { %1061 = vst [vmem:[%s2351_s9 + $0x38] sm:$0xff] %v1051_v4  ;;  %v1083_v60 = vmul.f32 %v1051_v4, %v1051_v4 }
 0x148   : > { %v1064_v47 = vadd.f32 %v1063_v22, %v1031_v7  ;;  %v1085_v41 = vadd.f32 %v1084_v36, %v1078_v40  ;;  %1060 = vst [vmem:[%s2351_s9 + $0x30] sm:$0xff] %v1046_v43  ;;  %v1082_v59 = vmul.f32 %v1046_v43, %v1046_v43 }
 0x14a   : > { %v1086_v49 = vadd.f32 %v1085_v41, %v1079_v46  ;;  %v1065_v51 = vadd.f32 %v1064_v47, %v1036_v32 }
 0x14c   : > { %v1066_v56 = vadd.f32 %v1065_v51, %v1041_v31  ;;  %v1087_v57 = vadd.f32 %v1086_v49, %v1080_v38 }
 0x14e   : > { %v1067_v50 = vadd.f32 %v1066_v56, %v1046_v43  ;;  %v1088_v45 = vadd.f32 %v1087_v57, %v1081_v55 }
 0x150   : > { %v1068_v61 = vadd.f32 %v1067_v50, %v1051_v4  ;;  %v1089_v63 = vadd.f32 %v1088_v45, %v1082_v59 }
 0x152   : > { %v1069_v0 = vrot.slane %v1068_v61, 4  ;;  %v1090_v1 = vadd.f32 %v1089_v63, %v1083_v60 }
 0x154   : > { %v1070_v3 = vadd.f32 %v1069_v0, %v1068_v61  ;;  %v1091_v5 = vrot.slane %v1090_v1, 4 }
 0x156   : > { %v1071_v53 = vrot.slane %v1070_v3, 2  ;;  %v1092_v6 = vadd.f32 %v1091_v5, %v1090_v1 }
 0x158   : > { %v1072_v10 = vadd.f32 %v1071_v53, %v1070_v3  ;;  %v1093_v12 = vrot.slane %v1092_v6, 2 }
 0x15a   : > { %v1073_v13 = vrot.slane %v1072_v10, 1  ;;  %v1094_v14 = vadd.f32 %v1093_v12, %v1092_v6 }
 0x15c   : > { %v1074_v15 = vadd.f32 %v1073_v13, %v1072_v10  ;;  %v1095_v62 = vrot.slane %v1094_v14, 1 }
 0x15e   : > { %1075 = vst [vmem:[%s235_s12] sm:$0x1] %v1074_v15  ;;  %v1096_v24 = vadd.f32 %v1095_v62, %v1094_v14 }
 0x160   : > { %1097 = vst [vmem:[%s235_s12 + $0x1] sm:$0x1] %v1096_v24 }
 0x161 PF: > { %s16_s18 = sadd.s32 1, %s1683_s18  }
 0x162   : > { %p13_p4 = scmp.ge.s32.totalorder %s16_s18, 4  }
 0x164   :  { %15 = sbr.rel (!%p13_p4) target bundleno = 1 (0x1), region = 81 }

</bundles_post_ra>
